<compile_context>
chip_gen: v7x
topology: tpu7x:2x2x1
jax: 0.10.0
libtpu: 0.0.40
codegen_flags: <defaults>
</compile_context>

<pallas_src>
import functools

import jax
import jax.numpy as jnp
from jax import lax
from jax.experimental import pallas as pl
from jax.experimental.pallas import tpu as pltpu


def _round_up(v, m):
    return (v + m - 1) // m * m


def _full_spec(shape):
    zeros = (0,) * len(shape)
    return pl.BlockSpec(shape, lambda i, _z=zeros: _z)


def _dense_block_kernel(*refs, num_layers, c0p, gp, w, nhw, eps):
    """Fused DenseBlock forward.

    refs = (x_ref, mask_ref,
            gamma_0, beta_0, w_0, bias_0, ..., gamma_{L-1}, beta_{L-1}, w_{L-1}, bias_{L-1},
            o_ref, taps_ref)

    x_ref    : (C0p, N*HW)           channel-padded input, batch folded into lanes
    mask_ref : (9, N*HW)             per-tap zero-padding masks, tiled per image
    gamma_l  : (Cin_pad, 1)          BN weight (0 on padding channels)
    beta_l   : (Cin_pad, 1)          BN bias   (0 on padding channels)
    w_l      : (Cout_pad, 9*Cin_pad) conv weight, column = tap*Cin_pad + ci
    bias_l   : (Cout_pad, 1)         conv bias (0 on padding channels)
    o_ref    : (C_total_pad, N*HW)   output slab; doubles as the dense-concat buffer
    taps_ref : (9*Cin_pad_max, N*HW) VMEM scratch for the im2col tap stack
    """
    x_ref = refs[0]
    mask_ref = refs[1]
    param_refs = refs[2:2 + 4 * num_layers]
    o_ref = refs[2 + 4 * num_layers]
    taps_ref = refs[3 + 4 * num_layers]

    # Seed the slab with the (channel-padded) input channels.
    o_ref[:c0p, :] = x_ref[...]

    inv_count = 1.0 / float(nhw)

    for l in range(num_layers):
        g_ref, b_ref, w_ref, bias_ref = param_refs[4 * l:4 * l + 4]
        cin = c0p + l * gp                       # padded input-channel count (multiple of 8)

        # ---- BatchNorm (training mode): two-pass centered stats, one slab read ----
        xn = o_ref[:cin, :]                                  # (cin, N*HW)
        mean = jnp.sum(xn, axis=1, keepdims=True) * inv_count
        xc = xn - mean
        var = jnp.sum(xc * xc, axis=1, keepdims=True) * inv_count   # biased, centered
        scale = g_ref[...] * lax.rsqrt(var + eps)            # (cin, 1)
        act = jnp.maximum(xc * scale + b_ref[...], 0.0)      # BN affine + ReLU, (cin, N*HW)

        # ---- im2col: 9 lane-rolled + masked copies stacked on sublanes (8-aligned) ----
        for t in range(9):
            dy, dx = t // 3 - 1, t % 3 - 1
            d = dy * w + dx                                  # flat spatial offset
            if d == 0:
                tap = act                                    # center tap: always in-bounds
            else:
                # tap[p] = act[(p + d) % (N*HW)]; wrapped / out-of-image pixels are
                # zeroed by the per-image mask, so cross-image wrap is harmless.
                tap = pltpu.roll(act, (-d) % nhw, axis=1) * mask_ref[t:t + 1, :]
            taps_ref[t * cin:(t + 1) * cin, :] = tap

        # ---- 3x3 conv as a single MXU matmul per layer ----
        acc = jnp.dot(w_ref[...], taps_ref[:9 * cin, :],
                      preferred_element_type=jnp.float32)    # (gp, N*HW)
        # Dense concat: new channels appended at an 8-aligned slab offset.
        o_ref[cin:cin + gp, :] = acc + bias_ref[...]


def dense_block_forward(x_nchw, params, *, eps=1e-5):
    """DenseBlock.forward: NCHW in, NCHW out (channels grow by num_channels per layer)."""
    n, c0, h, w = x_nchw.shape
    hw = h * w
    nhw = n * hw
    num_layers = len(params)
    growth = params[0][3].shape[0]
    c_total = c0 + num_layers * growth

    c0p = _round_up(c0, 8)
    gp = _round_up(growth, 8)
    c_total_pad = c0p + num_layers * gp

    # (N, C, H, W) -> (C, N*H*W): batch folded into lanes; pad channels to 8.
    x_flat = jnp.transpose(x_nchw.astype(jnp.float32), (1, 0, 2, 3)).reshape(c0, nhw)
    if c0p > c0:
        x_flat = jnp.concatenate([x_flat, jnp.zeros((c0p - c0, nhw), jnp.float32)], axis=0)

    # Per-tap zero-padding masks over the flattened spatial axis, tiled per image.
    yy, xx = jnp.meshgrid(jnp.arange(h), jnp.arange(w), indexing="ij")
    ys = yy.reshape(1, hw)
    xs = xx.reshape(1, hw)
    masks = []
    for t in range(9):
        dy, dx = t // 3 - 1, t % 3 - 1
        ok = (ys + dy >= 0) & (ys + dy < h) & (xs + dx >= 0) & (xs + dx < w)
        masks.append(ok.astype(jnp.float32))
    mask9 = jnp.tile(jnp.concatenate(masks, axis=0), (1, n))     # (9, N*HW)

    def pad_groups(arr, axis, n_prev):
        """Pad each dense-concat channel group (c0, then n_prev x growth) to 8-aligned width."""
        sizes = [c0] + [growth] * n_prev
        pads = [c0p] + [gp] * n_prev
        pieces, idx = [], 0
        for sz, pz in zip(sizes, pads):
            chunk = lax.slice_in_dim(arr, idx, idx + sz, axis=axis)
            if pz > sz:
                pshape = list(chunk.shape)
                pshape[axis] = pz - sz
                chunk = jnp.concatenate([chunk, jnp.zeros(pshape, chunk.dtype)], axis=axis)
            pieces.append(chunk)
            idx += sz
        return jnp.concatenate(pieces, axis=axis)

    inputs = [x_flat, mask9]
    in_specs = [_full_spec(x_flat.shape), _full_spec(mask9.shape)]
    for l, (gamma, beta, w_hwio, bias) in enumerate(params):
        cin = c0 + l * growth
        cin_pad = c0p + l * gp
        g2 = pad_groups(gamma.astype(jnp.float32), 0, l).reshape(cin_pad, 1)
        b2 = pad_groups(beta.astype(jnp.float32), 0, l).reshape(cin_pad, 1)
        # HWIO (3,3,cin,cout) -> (cout, 9, cin) -> pad ci groups -> pad cout -> (gp, 9*cin_pad)
        wt = jnp.transpose(w_hwio.astype(jnp.float32), (3, 0, 1, 2)).reshape(growth, 9, cin)
        wt = pad_groups(wt, 2, l)                                 # (growth, 9, cin_pad)
        if gp > growth:
            wt = jnp.concatenate(
                [wt, jnp.zeros((gp - growth, 9, cin_pad), jnp.float32)], axis=0)
        w2 = wt.reshape(gp, 9 * cin_pad)
        bb = bias.astype(jnp.float32).reshape(growth, 1)
        if gp > growth:
            bb = jnp.concatenate([bb, jnp.zeros((gp - growth, 1), jnp.float32)], axis=0)
        inputs += [g2, b2, w2, bb]
        in_specs += [_full_spec(g2.shape), _full_spec(b2.shape),
                     _full_spec(w2.shape), _full_spec(bb.shape)]

    kernel = functools.partial(
        _dense_block_kernel, num_layers=num_layers, c0p=c0p, gp=gp,
        w=w, nhw=nhw, eps=eps)

    taps_rows = 9 * (c0p + (num_layers - 1) * gp)

    out_slab = pl.pallas_call(
        kernel,
        out_shape=jax.ShapeDtypeStruct((c_total_pad, nhw), jnp.float32),
        grid_spec=pltpu.PrefetchScalarGridSpec(
            num_scalar_prefetch=0,
            grid=(1,),
            in_specs=in_specs,
            out_specs=_full_spec((c_total_pad, nhw)),
            scratch_shapes=[pltpu.VMEM((taps_rows, nhw), jnp.float32)],
        ),
        compiler_params=pltpu.CompilerParams(
            dimension_semantics=("arbitrary",),
            vmem_limit_bytes=32 * 1024 * 1024,
        ),
    )(*inputs)

    # Strip the channel padding and restore NCHW.
    parts = [out_slab[:c0]]
    for l in range(num_layers):
        off = c0p + l * gp
        parts.append(out_slab[off:off + growth])
    out_flat = jnp.concatenate(parts, axis=0)                     # (c_total, N*HW)
    return out_flat.reshape(c_total, n, h, w).transpose(1, 0, 2, 3)


def dense_block_reference(x_nchw, params, *, eps=1e-5):
    """Pure-JAX reference (training-mode BN with biased variance, conv padding=1)."""
    x = x_nchw.astype(jnp.float32)
    for gamma, beta, w_hwio, bias in params:
        mean = jnp.mean(x, axis=(0, 2, 3), keepdims=True)
        var = jnp.var(x, axis=(0, 2, 3), keepdims=True)           # biased
        a = jnp.maximum((x - mean) * lax.rsqrt(var + eps)
                        * gamma.reshape(1, -1, 1, 1) + beta.reshape(1, -1, 1, 1), 0.0)
        y = lax.conv_general_dilated(
            a, w_hwio, window_strides=(1, 1), padding="SAME",
            dimension_numbers=("NCHW", "HWIO", "NCHW"),
            precision=lax.Precision.HIGHEST)
        y = y + bias.reshape(1, -1, 1, 1)
        x = jnp.concatenate([x, y], axis=1)
    return x


def init_dense_block_params(key, num_convs, input_channels, num_channels):
    """Deterministic synthetic parameters (shapes match the PyTorch module)."""
    params = []
    for i in range(num_convs):
        cin = input_channels + i * num_channels
        key, k1, k2, k3, k4 = jax.random.split(key, 5)
        gamma = 1.0 + 0.1 * jax.random.normal(k1, (cin,), jnp.float32)
        beta = 0.1 * jax.random.normal(k2, (cin,), jnp.float32)
        w = 0.1 * jax.random.normal(k3, (3, 3, cin, num_channels), jnp.float32)  # HWIO
        b = 0.1 * jax.random.normal(k4, (num_channels,), jnp.float32)
        params.append((gamma, beta, w, b))
    return params


# TODO(synk): PyTorch BatchNorm2d also updates running_mean/running_var buffers as a
# training-time side effect; that buffer update does not affect the forward output and
# is not implemented here.

if __name__ == "__main__":
    num_convs = 2
    input_channels = 4
    num_channels = 4
    N, H, W = 2, 16, 16

    key = jax.random.PRNGKey(0)
    key, xkey = jax.random.split(key)
    x = jax.random.normal(xkey, (N, input_channels, H, W), jnp.float32)
    params = init_dense_block_params(key, num_convs, input_channels, num_channels)

    out = jax.jit(dense_block_forward)(x, params)
    out = jax.block_until_ready(out)

    expected_channels = input_channels + num_convs * num_channels
    assert out.shape == (N, expected_channels, H, W), out.shape
    assert bool(jnp.all(jnp.isfinite(out)))

    ref = dense_block_reference(x, params)
    err = float(jnp.max(jnp.abs(out - ref)))
    # Centered two-pass variance removes the E[x^2]-E[x]^2 cancellation; the remaining
    # tolerance budget covers the MXU's f32 multi-pass matmul vs. HIGHEST-precision conv.
    assert err < 1e-2, f"max |kernel - reference| = {err}"

    print("KERNEL_OK")
</pallas_src>

<mosaic_0001>
module attributes {stable_mosaic.version = 11 : i64} {
  func.func @_dense_block_kernel(%arg0: i32, %arg1: memref<8x512xf32, #tpu.memory_space<vmem>>, %arg2: memref<9x512xf32, #tpu.memory_space<vmem>>, %arg3: memref<8x1xf32, #tpu.memory_space<vmem>>, %arg4: memref<8x1xf32, #tpu.memory_space<vmem>>, %arg5: memref<8x72xf32, #tpu.memory_space<vmem>>, %arg6: memref<8x1xf32, #tpu.memory_space<vmem>>, %arg7: memref<16x1xf32, #tpu.memory_space<vmem>>, %arg8: memref<16x1xf32, #tpu.memory_space<vmem>>, %arg9: memref<8x144xf32, #tpu.memory_space<vmem>>, %arg10: memref<8x1xf32, #tpu.memory_space<vmem>>, %arg11: memref<24x512xf32, #tpu.memory_space<vmem>>, %arg12: memref<144x512xf32, #tpu.memory_space<vmem>>) attributes {dimension_semantics = [#tpu.dimension_semantics<arbitrary>], iteration_bounds = array<i64: 1>, scalar_prefetch = 0 : i64, scratch_operands = 1 : i64, tpu.core_type = #tpu.core_type<tc>, window_params = [{pipeline_mode = #tpu.pipeline_mode<synchronous>, transform_indices = @transform_0, window_bounds = array<i64: 8, 512>}, {pipeline_mode = #tpu.pipeline_mode<synchronous>, transform_indices = @transform_1, window_bounds = array<i64: 9, 512>}, {pipeline_mode = #tpu.pipeline_mode<synchronous>, transform_indices = @transform_2, window_bounds = array<i64: 8, 1>}, {pipeline_mode = #tpu.pipeline_mode<synchronous>, transform_indices = @transform_3, window_bounds = array<i64: 8, 1>}, {pipeline_mode = #tpu.pipeline_mode<synchronous>, transform_indices = @transform_4, window_bounds = array<i64: 8, 72>}, {pipeline_mode = #tpu.pipeline_mode<synchronous>, transform_indices = @transform_5, window_bounds = array<i64: 8, 1>}, {pipeline_mode = #tpu.pipeline_mode<synchronous>, transform_indices = @transform_6, window_bounds = array<i64: 16, 1>}, {pipeline_mode = #tpu.pipeline_mode<synchronous>, transform_indices = @transform_7, window_bounds = array<i64: 16, 1>}, {pipeline_mode = #tpu.pipeline_mode<synchronous>, transform_indices = @transform_8, window_bounds = array<i64: 8, 144>}, {pipeline_mode = #tpu.pipeline_mode<synchronous>, transform_indices = @transform_9, window_bounds = array<i64: 8, 1>}, {pipeline_mode = #tpu.pipeline_mode<synchronous>, transform_indices = @transform_10, window_bounds = array<i64: 24, 512>}]} {
    %c0 = arith.constant 0 : index
    %c0_0 = arith.constant 0 : index
    %0 = vector.load %arg1[%c0, %c0_0] : memref<8x512xf32, #tpu.memory_space<vmem>>, vector<8x512xf32>
    %c0_1 = arith.constant 0 : index
    %c0_2 = arith.constant 0 : index
    %1 = vector.load %arg11[%c0_1, %c0_2] : memref<24x512xf32, #tpu.memory_space<vmem>>, vector<8x512xf32>
    tpu.vector_store %arg11[%c0_1, %c0_2], %0 {strides = array<i32>} : memref<24x512xf32, #tpu.memory_space<vmem>>, vector<8x512xf32>,
    %c0_3 = arith.constant 0 : index
    %c0_4 = arith.constant 0 : index
    %2 = vector.load %arg11[%c0_3, %c0_4] : memref<24x512xf32, #tpu.memory_space<vmem>>, vector<8x512xf32>
    %cst = arith.constant dense<0.000000e+00> : vector<8xf32>
    %3 = vector.multi_reduction <add>, %2, %cst [1] : vector<8x512xf32> to vector<8xf32>
    %4 = vector.shape_cast %3 : vector<8xf32> to vector<8x1xf32>
    %cst_5 = arith.constant 0.001953125 : f32
    %5 = vector.broadcast %cst_5 : f32 to vector<8x1xf32>
    %6 = arith.mulf %4, %5 : vector<8x1xf32>
    %7 = vector.broadcast %6 : vector<8x1xf32> to vector<8x512xf32>
    %8 = arith.subf %2, %7 : vector<8x512xf32>
    %9 = arith.mulf %8, %8 : vector<8x512xf32>
    %cst_6 = arith.constant dense<0.000000e+00> : vector<8xf32>
    %10 = vector.multi_reduction <add>, %9, %cst_6 [1] : vector<8x512xf32> to vector<8xf32>
    %11 = vector.shape_cast %10 : vector<8xf32> to vector<8x1xf32>
    %cst_7 = arith.constant 0.001953125 : f32
    %12 = vector.broadcast %cst_7 : f32 to vector<8x1xf32>
    %13 = arith.mulf %11, %12 : vector<8x1xf32>
    %c0_8 = arith.constant 0 : index
    %c0_9 = arith.constant 0 : index
    %14 = vector.load %arg3[%c0_8, %c0_9] : memref<8x1xf32, #tpu.memory_space<vmem>>, vector<8x1xf32>
    %cst_10 = arith.constant 9.99999974E-6 : f32
    %15 = vector.broadcast %cst_10 : f32 to vector<8x1xf32>
    %16 = arith.addf %13, %15 : vector<8x1xf32>
    %17 = math.rsqrt %16 : vector<8x1xf32>
    %18 = arith.mulf %14, %17 : vector<8x1xf32>
    %19 = vector.broadcast %18 : vector<8x1xf32> to vector<8x512xf32>
    %20 = arith.mulf %8, %19 : vector<8x512xf32>
    %c0_11 = arith.constant 0 : index
    %c0_12 = arith.constant 0 : index
    %21 = vector.load %arg4[%c0_11, %c0_12] : memref<8x1xf32, #tpu.memory_space<vmem>>, vector<8x1xf32>
    %22 = vector.broadcast %21 : vector<8x1xf32> to vector<8x512xf32>
    %23 = arith.addf %20, %22 : vector<8x512xf32>
    %cst_13 = arith.constant 0.000000e+00 : f32
    %24 = vector.broadcast %cst_13 : f32 to vector<8x512xf32>
    %25 = arith.maximumf %23, %24 : vector<8x512xf32>
    %c17_i32 = arith.constant 17 : i32
    %26 = tpu.dynamic_rotate %25 by %c17_i32 dim 1 : vector<8x512xf32>, i32 -> vector<8x512xf32>
    %c0_14 = arith.constant 0 : index
    %c0_15 = arith.constant 0 : index
    %27 = vector.load %arg2[%c0_14, %c0_15] : memref<9x512xf32, #tpu.memory_space<vmem>>, vector<1x512xf32>
    %28 = vector.broadcast %27 : vector<1x512xf32> to vector<8x512xf32>
    %29 = arith.mulf %26, %28 : vector<8x512xf32>
    %c0_16 = arith.constant 0 : index
    %c0_17 = arith.constant 0 : index
    %30 = vector.load %arg12[%c0_16, %c0_17] : memref<144x512xf32, #tpu.memory_space<vmem>>, vector<8x512xf32>
    tpu.vector_store %arg12[%c0_16, %c0_17], %29 {strides = array<i32>} : memref<144x512xf32, #tpu.memory_space<vmem>>, vector<8x512xf32>,
    %c16_i32 = arith.constant 16 : i32
    %31 = tpu.dynamic_rotate %25 by %c16_i32 dim 1 : vector<8x512xf32>, i32 -> vector<8x512xf32>
    %c1 = arith.constant 1 : index
    %c0_18 = arith.constant 0 : index
    %32 = vector.load %arg2[%c1, %c0_18] : memref<9x512xf32, #tpu.memory_space<vmem>>, vector<1x512xf32>
    %33 = vector.broadcast %32 : vector<1x512xf32> to vector<8x512xf32>
    %34 = arith.mulf %31, %33 : vector<8x512xf32>
    %c8 = arith.constant 8 : index
    %c0_19 = arith.constant 0 : index
    %35 = vector.load %arg12[%c8, %c0_19] : memref<144x512xf32, #tpu.memory_space<vmem>>, vector<8x512xf32>
    tpu.vector_store %arg12[%c8, %c0_19], %34 {strides = array<i32>} : memref<144x512xf32, #tpu.memory_space<vmem>>, vector<8x512xf32>,
    %c15_i32 = arith.constant 15 : i32
    %36 = tpu.dynamic_rotate %25 by %c15_i32 dim 1 : vector<8x512xf32>, i32 -> vector<8x512xf32>
    %c2 = arith.constant 2 : index
    %c0_20 = arith.constant 0 : index
    %37 = vector.load %arg2[%c2, %c0_20] : memref<9x512xf32, #tpu.memory_space<vmem>>, vector<1x512xf32>
    %38 = vector.broadcast %37 : vector<1x512xf32> to vector<8x512xf32>
    %39 = arith.mulf %36, %38 : vector<8x512xf32>
    %c16 = arith.constant 16 : index
    %c0_21 = arith.constant 0 : index
    %40 = vector.load %arg12[%c16, %c0_21] : memref<144x512xf32, #tpu.memory_space<vmem>>, vector<8x512xf32>
    tpu.vector_store %arg12[%c16, %c0_21], %39 {strides = array<i32>} : memref<144x512xf32, #tpu.memory_space<vmem>>, vector<8x512xf32>,
    %c1_i32 = arith.constant 1 : i32
    %41 = tpu.dynamic_rotate %25 by %c1_i32 dim 1 : vector<8x512xf32>, i32 -> vector<8x512xf32>
    %c3 = arith.constant 3 : index
    %c0_22 = arith.constant 0 : index
    %42 = vector.load %arg2[%c3, %c0_22] : memref<9x512xf32, #tpu.memory_space<vmem>>, vector<1x512xf32>
    %43 = vector.broadcast %42 : vector<1x512xf32> to vector<8x512xf32>
    %44 = arith.mulf %41, %43 : vector<8x512xf32>
    %c24 = arith.constant 24 : index
    %c0_23 = arith.constant 0 : index
    %45 = vector.load %arg12[%c24, %c0_23] : memref<144x512xf32, #tpu.memory_space<vmem>>, vector<8x512xf32>
    tpu.vector_store %arg12[%c24, %c0_23], %44 {strides = array<i32>} : memref<144x512xf32, #tpu.memory_space<vmem>>, vector<8x512xf32>,
    %c32 = arith.constant 32 : index
    %c0_24 = arith.constant 0 : index
    %46 = vector.load %arg12[%c32, %c0_24] : memref<144x512xf32, #tpu.memory_space<vmem>>, vector<8x512xf32>
    tpu.vector_store %arg12[%c32, %c0_24], %25 {strides = array<i32>} : memref<144x512xf32, #tpu.memory_space<vmem>>, vector<8x512xf32>,
    %c511_i32 = arith.constant 511 : i32
    %47 = tpu.dynamic_rotate %25 by %c511_i32 dim 1 : vector<8x512xf32>, i32 -> vector<8x512xf32>
    %c5 = arith.constant 5 : index
    %c0_25 = arith.constant 0 : index
    %48 = vector.load %arg2[%c5, %c0_25] : memref<9x512xf32, #tpu.memory_space<vmem>>, vector<1x512xf32>
    %49 = vector.broadcast %48 : vector<1x512xf32> to vector<8x512xf32>
    %50 = arith.mulf %47, %49 : vector<8x512xf32>
    %c40 = arith.constant 40 : index
    %c0_26 = arith.constant 0 : index
    %51 = vector.load %arg12[%c40, %c0_26] : memref<144x512xf32, #tpu.memory_space<vmem>>, vector<8x512xf32>
    tpu.vector_store %arg12[%c40, %c0_26], %50 {strides = array<i32>} : memref<144x512xf32, #tpu.memory_space<vmem>>, vector<8x512xf32>,
    %c497_i32 = arith.constant 497 : i32
    %52 = tpu.dynamic_rotate %25 by %c497_i32 dim 1 : vector<8x512xf32>, i32 -> vector<8x512xf32>
    %c6 = arith.constant 6 : index
    %c0_27 = arith.constant 0 : index
    %53 = vector.load %arg2[%c6, %c0_27] : memref<9x512xf32, #tpu.memory_space<vmem>>, vector<1x512xf32>
    %54 = vector.broadcast %53 : vector<1x512xf32> to vector<8x512xf32>
    %55 = arith.mulf %52, %54 : vector<8x512xf32>
    %c48 = arith.constant 48 : index
    %c0_28 = arith.constant 0 : index
    %56 = vector.load %arg12[%c48, %c0_28] : memref<144x512xf32, #tpu.memory_space<vmem>>, vector<8x512xf32>
    tpu.vector_store %arg12[%c48, %c0_28], %55 {strides = array<i32>} : memref<144x512xf32, #tpu.memory_space<vmem>>, vector<8x512xf32>,
    %c496_i32 = arith.constant 496 : i32
    %57 = tpu.dynamic_rotate %25 by %c496_i32 dim 1 : vector<8x512xf32>, i32 -> vector<8x512xf32>
    %c7 = arith.constant 7 : index
    %c0_29 = arith.constant 0 : index
    %58 = vector.load %arg2[%c7, %c0_29] : memref<9x512xf32, #tpu.memory_space<vmem>>, vector<1x512xf32>
    %59 = vector.broadcast %58 : vector<1x512xf32> to vector<8x512xf32>
    %60 = arith.mulf %57, %59 : vector<8x512xf32>
    %c56 = arith.constant 56 : index
    %c0_30 = arith.constant 0 : index
    %61 = vector.load %arg12[%c56, %c0_30] : memref<144x512xf32, #tpu.memory_space<vmem>>, vector<8x512xf32>
    tpu.vector_store %arg12[%c56, %c0_30], %60 {strides = array<i32>} : memref<144x512xf32, #tpu.memory_space<vmem>>, vector<8x512xf32>,
    %c495_i32 = arith.constant 495 : i32
    %62 = tpu.dynamic_rotate %25 by %c495_i32 dim 1 : vector<8x512xf32>, i32 -> vector<8x512xf32>
    %c8_31 = arith.constant 8 : index
    %c0_32 = arith.constant 0 : index
    %63 = vector.load %arg2[%c8_31, %c0_32] : memref<9x512xf32, #tpu.memory_space<vmem>>, vector<1x512xf32>
    %64 = vector.broadcast %63 : vector<1x512xf32> to vector<8x512xf32>
    %65 = arith.mulf %62, %64 : vector<8x512xf32>
    %c64 = arith.constant 64 : index
    %c0_33 = arith.constant 0 : index
    %66 = vector.load %arg12[%c64, %c0_33] : memref<144x512xf32, #tpu.memory_space<vmem>>, vector<8x512xf32>
    tpu.vector_store %arg12[%c64, %c0_33], %65 {strides = array<i32>} : memref<144x512xf32, #tpu.memory_space<vmem>>, vector<8x512xf32>,
    %c0_34 = arith.constant 0 : index
    %c0_35 = arith.constant 0 : index
    %67 = vector.load %arg5[%c0_34, %c0_35] : memref<8x72xf32, #tpu.memory_space<vmem>>, vector<8x72xf32>
    %c0_36 = arith.constant 0 : index
    %c0_37 = arith.constant 0 : index
    %68 = vector.load %arg12[%c0_36, %c0_37] : memref<144x512xf32, #tpu.memory_space<vmem>>, vector<72x512xf32>
    %cst_38 = arith.constant dense<0.000000e+00> : vector<8x512xf32>
    %69 = tpu.matmul %67, %68, %cst_38 {dimension_numbers = #tpu.dot_dimension_numbers<[1], [0], [0], [1], [0, 0, 1, 1], [], []>} : vector<8x72xf32>, vector<72x512xf32>, vector<8x512xf32> -> vector<8x512xf32>
    %c0_39 = arith.constant 0 : index
    %c0_40 = arith.constant 0 : index
    %70 = vector.load %arg6[%c0_39, %c0_40] : memref<8x1xf32, #tpu.memory_space<vmem>>, vector<8x1xf32>
    %71 = vector.broadcast %70 : vector<8x1xf32> to vector<8x512xf32>
    %72 = arith.addf %69, %71 : vector<8x512xf32>
    %c8_41 = arith.constant 8 : index
    %c0_42 = arith.constant 0 : index
    %73 = vector.load %arg11[%c8_41, %c0_42] : memref<24x512xf32, #tpu.memory_space<vmem>>, vector<8x512xf32>
    tpu.vector_store %arg11[%c8_41, %c0_42], %72 {strides = array<i32>} : memref<24x512xf32, #tpu.memory_space<vmem>>, vector<8x512xf32>,
    %c0_43 = arith.constant 0 : index
    %c0_44 = arith.constant 0 : index
    %74 = vector.load %arg11[%c0_43, %c0_44] : memref<24x512xf32, #tpu.memory_space<vmem>>, vector<16x512xf32>
    %cst_45 = arith.constant dense<0.000000e+00> : vector<16xf32>
    %75 = vector.multi_reduction <add>, %74, %cst_45 [1] : vector<16x512xf32> to vector<16xf32>
    %76 = vector.shape_cast %75 : vector<16xf32> to vector<16x1xf32>
    %cst_46 = arith.constant 0.001953125 : f32
    %77 = vector.broadcast %cst_46 : f32 to vector<16x1xf32>
    %78 = arith.mulf %76, %77 : vector<16x1xf32>
    %79 = vector.broadcast %78 : vector<16x1xf32> to vector<16x512xf32>
    %80 = arith.subf %74, %79 : vector<16x512xf32>
    %81 = arith.mulf %80, %80 : vector<16x512xf32>
    %cst_47 = arith.constant dense<0.000000e+00> : vector<16xf32>
    %82 = vector.multi_reduction <add>, %81, %cst_47 [1] : vector<16x512xf32> to vector<16xf32>
    %83 = vector.shape_cast %82 : vector<16xf32> to vector<16x1xf32>
    %cst_48 = arith.constant 0.001953125 : f32
    %84 = vector.broadcast %cst_48 : f32 to vector<16x1xf32>
    %85 = arith.mulf %83, %84 : vector<16x1xf32>
    %c0_49 = arith.constant 0 : index
    %c0_50 = arith.constant 0 : index
    %86 = vector.load %arg7[%c0_49, %c0_50] : memref<16x1xf32, #tpu.memory_space<vmem>>, vector<16x1xf32>
    %cst_51 = arith.constant 9.99999974E-6 : f32
    %87 = vector.broadcast %cst_51 : f32 to vector<16x1xf32>
    %88 = arith.addf %85, %87 : vector<16x1xf32>
    %89 = math.rsqrt %88 : vector<16x1xf32>
    %90 = arith.mulf %86, %89 : vector<16x1xf32>
    %91 = vector.broadcast %90 : vector<16x1xf32> to vector<16x512xf32>
    %92 = arith.mulf %80, %91 : vector<16x512xf32>
    %c0_52 = arith.constant 0 : index
    %c0_53 = arith.constant 0 : index
    %93 = vector.load %arg8[%c0_52, %c0_53] : memref<16x1xf32, #tpu.memory_space<vmem>>, vector<16x1xf32>
    %94 = vector.broadcast %93 : vector<16x1xf32> to vector<16x512xf32>
    %95 = arith.addf %92, %94 : vector<16x512xf32>
    %cst_54 = arith.constant 0.000000e+00 : f32
    %96 = vector.broadcast %cst_54 : f32 to vector<16x512xf32>
    %97 = arith.maximumf %95, %96 : vector<16x512xf32>
    %c17_i32_55 = arith.constant 17 : i32
    %98 = tpu.dynamic_rotate %97 by %c17_i32_55 dim 1 : vector<16x512xf32>, i32 -> vector<16x512xf32>
    %c0_56 = arith.constant 0 : index
    %c0_57 = arith.constant 0 : index
    %99 = vector.load %arg2[%c0_56, %c0_57] : memref<9x512xf32, #tpu.memory_space<vmem>>, vector<1x512xf32>
    %100 = vector.broadcast %99 : vector<1x512xf32> to vector<16x512xf32>
    %101 = arith.mulf %98, %100 : vector<16x512xf32>
    %c0_58 = arith.constant 0 : index
    %c0_59 = arith.constant 0 : index
    %102 = vector.load %arg12[%c0_58, %c0_59] : memref<144x512xf32, #tpu.memory_space<vmem>>, vector<16x512xf32>
    tpu.vector_store %arg12[%c0_58, %c0_59], %101 {strides = array<i32>} : memref<144x512xf32, #tpu.memory_space<vmem>>, vector<16x512xf32>,
    %c16_i32_60 = arith.constant 16 : i32
    %103 = tpu.dynamic_rotate %97 by %c16_i32_60 dim 1 : vector<16x512xf32>, i32 -> vector<16x512xf32>
    %c1_61 = arith.constant 1 : index
    %c0_62 = arith.constant 0 : index
    %104 = vector.load %arg2[%c1_61, %c0_62] : memref<9x512xf32, #tpu.memory_space<vmem>>, vector<1x512xf32>
    %105 = vector.broadcast %104 : vector<1x512xf32> to vector<16x512xf32>
    %106 = arith.mulf %103, %105 : vector<16x512xf32>
    %c16_63 = arith.constant 16 : index
    %c0_64 = arith.constant 0 : index
    %107 = vector.load %arg12[%c16_63, %c0_64] : memref<144x512xf32, #tpu.memory_space<vmem>>, vector<16x512xf32>
    tpu.vector_store %arg12[%c16_63, %c0_64], %106 {strides = array<i32>} : memref<144x512xf32, #tpu.memory_space<vmem>>, vector<16x512xf32>,
    %c15_i32_65 = arith.constant 15 : i32
    %108 = tpu.dynamic_rotate %97 by %c15_i32_65 dim 1 : vector<16x512xf32>, i32 -> vector<16x512xf32>
    %c2_66 = arith.constant 2 : index
    %c0_67 = arith.constant 0 : index
    %109 = vector.load %arg2[%c2_66, %c0_67] : memref<9x512xf32, #tpu.memory_space<vmem>>, vector<1x512xf32>
    %110 = vector.broadcast %109 : vector<1x512xf32> to vector<16x512xf32>
    %111 = arith.mulf %108, %110 : vector<16x512xf32>
    %c32_68 = arith.constant 32 : index
    %c0_69 = arith.constant 0 : index
    %112 = vector.load %arg12[%c32_68, %c0_69] : memref<144x512xf32, #tpu.memory_space<vmem>>, vector<16x512xf32>
    tpu.vector_store %arg12[%c32_68, %c0_69], %111 {strides = array<i32>} : memref<144x512xf32, #tpu.memory_space<vmem>>, vector<16x512xf32>,
    %c1_i32_70 = arith.constant 1 : i32
    %113 = tpu.dynamic_rotate %97 by %c1_i32_70 dim 1 : vector<16x512xf32>, i32 -> vector<16x512xf32>
    %c3_71 = arith.constant 3 : index
    %c0_72 = arith.constant 0 : index
    %114 = vector.load %arg2[%c3_71, %c0_72] : memref<9x512xf32, #tpu.memory_space<vmem>>, vector<1x512xf32>
    %115 = vector.broadcast %114 : vector<1x512xf32> to vector<16x512xf32>
    %116 = arith.mulf %113, %115 : vector<16x512xf32>
    %c48_73 = arith.constant 48 : index
    %c0_74 = arith.constant 0 : index
    %117 = vector.load %arg12[%c48_73, %c0_74] : memref<144x512xf32, #tpu.memory_space<vmem>>, vector<16x512xf32>
    tpu.vector_store %arg12[%c48_73, %c0_74], %116 {strides = array<i32>} : memref<144x512xf32, #tpu.memory_space<vmem>>, vector<16x512xf32>,
    %c64_75 = arith.constant 64 : index
    %c0_76 = arith.constant 0 : index
    %118 = vector.load %arg12[%c64_75, %c0_76] : memref<144x512xf32, #tpu.memory_space<vmem>>, vector<16x512xf32>
    tpu.vector_store %arg12[%c64_75, %c0_76], %97 {strides = array<i32>} : memref<144x512xf32, #tpu.memory_space<vmem>>, vector<16x512xf32>,
    %c511_i32_77 = arith.constant 511 : i32
    %119 = tpu.dynamic_rotate %97 by %c511_i32_77 dim 1 : vector<16x512xf32>, i32 -> vector<16x512xf32>
    %c5_78 = arith.constant 5 : index
    %c0_79 = arith.constant 0 : index
    %120 = vector.load %arg2[%c5_78, %c0_79] : memref<9x512xf32, #tpu.memory_space<vmem>>, vector<1x512xf32>
    %121 = vector.broadcast %120 : vector<1x512xf32> to vector<16x512xf32>
    %122 = arith.mulf %119, %121 : vector<16x512xf32>
    %c80 = arith.constant 80 : index
    %c0_80 = arith.constant 0 : index
    %123 = vector.load %arg12[%c80, %c0_80] : memref<144x512xf32, #tpu.memory_space<vmem>>, vector<16x512xf32>
    tpu.vector_store %arg12[%c80, %c0_80], %122 {strides = array<i32>} : memref<144x512xf32, #tpu.memory_space<vmem>>, vector<16x512xf32>,
    %c497_i32_81 = arith.constant 497 : i32
    %124 = tpu.dynamic_rotate %97 by %c497_i32_81 dim 1 : vector<16x512xf32>, i32 -> vector<16x512xf32>
    %c6_82 = arith.constant 6 : index
    %c0_83 = arith.constant 0 : index
    %125 = vector.load %arg2[%c6_82, %c0_83] : memref<9x512xf32, #tpu.memory_space<vmem>>, vector<1x512xf32>
    %126 = vector.broadcast %125 : vector<1x512xf32> to vector<16x512xf32>
    %127 = arith.mulf %124, %126 : vector<16x512xf32>
    %c96 = arith.constant 96 : index
    %c0_84 = arith.constant 0 : index
    %128 = vector.load %arg12[%c96, %c0_84] : memref<144x512xf32, #tpu.memory_space<vmem>>, vector<16x512xf32>
    tpu.vector_store %arg12[%c96, %c0_84], %127 {strides = array<i32>} : memref<144x512xf32, #tpu.memory_space<vmem>>, vector<16x512xf32>,
    %c496_i32_85 = arith.constant 496 : i32
    %129 = tpu.dynamic_rotate %97 by %c496_i32_85 dim 1 : vector<16x512xf32>, i32 -> vector<16x512xf32>
    %c7_86 = arith.constant 7 : index
    %c0_87 = arith.constant 0 : index
    %130 = vector.load %arg2[%c7_86, %c0_87] : memref<9x512xf32, #tpu.memory_space<vmem>>, vector<1x512xf32>
    %131 = vector.broadcast %130 : vector<1x512xf32> to vector<16x512xf32>
    %132 = arith.mulf %129, %131 : vector<16x512xf32>
    %c112 = arith.constant 112 : index
    %c0_88 = arith.constant 0 : index
    %133 = vector.load %arg12[%c112, %c0_88] : memref<144x512xf32, #tpu.memory_space<vmem>>, vector<16x512xf32>
    tpu.vector_store %arg12[%c112, %c0_88], %132 {strides = array<i32>} : memref<144x512xf32, #tpu.memory_space<vmem>>, vector<16x512xf32>,
    %c495_i32_89 = arith.constant 495 : i32
    %134 = tpu.dynamic_rotate %97 by %c495_i32_89 dim 1 : vector<16x512xf32>, i32 -> vector<16x512xf32>
    %c8_90 = arith.constant 8 : index
    %c0_91 = arith.constant 0 : index
    %135 = vector.load %arg2[%c8_90, %c0_91] : memref<9x512xf32, #tpu.memory_space<vmem>>, vector<1x512xf32>
    %136 = vector.broadcast %135 : vector<1x512xf32> to vector<16x512xf32>
    %137 = arith.mulf %134, %136 : vector<16x512xf32>
    %c128 = arith.constant 128 : index
    %c0_92 = arith.constant 0 : index
    %138 = vector.load %arg12[%c128, %c0_92] : memref<144x512xf32, #tpu.memory_space<vmem>>, vector<16x512xf32>
    tpu.vector_store %arg12[%c128, %c0_92], %137 {strides = array<i32>} : memref<144x512xf32, #tpu.memory_space<vmem>>, vector<16x512xf32>,
    %c0_93 = arith.constant 0 : index
    %c0_94 = arith.constant 0 : index
    %139 = vector.load %arg9[%c0_93, %c0_94] : memref<8x144xf32, #tpu.memory_space<vmem>>, vector<8x144xf32>
    %c0_95 = arith.constant 0 : index
    %c0_96 = arith.constant 0 : index
    %140 = vector.load %arg12[%c0_95, %c0_96] : memref<144x512xf32, #tpu.memory_space<vmem>>, vector<144x512xf32>
    %cst_97 = arith.constant dense<0.000000e+00> : vector<8x512xf32>
    %141 = tpu.matmul %139, %140, %cst_97 {dimension_numbers = #tpu.dot_dimension_numbers<[1], [0], [0], [1], [0, 0, 1, 1], [], []>} : vector<8x144xf32>, vector<144x512xf32>, vector<8x512xf32> -> vector<8x512xf32>
    %c0_98 = arith.constant 0 : index
    %c0_99 = arith.constant 0 : index
    %142 = vector.load %arg10[%c0_98, %c0_99] : memref<8x1xf32, #tpu.memory_space<vmem>>, vector<8x1xf32>
    %143 = vector.broadcast %142 : vector<8x1xf32> to vector<8x512xf32>
    %144 = arith.addf %141, %143 : vector<8x512xf32>
    %c16_100 = arith.constant 16 : index
    %c0_101 = arith.constant 0 : index
    %145 = vector.load %arg11[%c16_100, %c0_101] : memref<24x512xf32, #tpu.memory_space<vmem>>, vector<8x512xf32>
    tpu.vector_store %arg11[%c16_100, %c0_101], %144 {strides = array<i32>} : memref<24x512xf32, #tpu.memory_space<vmem>>, vector<8x512xf32>,
    return
  }
  func.func @transform_0(%arg0: i32) -> (i32, i32) {
    %c0_i32 = arith.constant 0 : i32
    %c0_i32_0 = arith.constant 0 : i32
    %c0_i32_1 = arith.constant 0 : i32
    return %c0_i32, %c0_i32_0 : i32, i32
  }
  func.func @transform_1(%arg0: i32) -> (i32, i32) {
    %c0_i32 = arith.constant 0 : i32
    %c0_i32_0 = arith.constant 0 : i32
    %c0_i32_1 = arith.constant 0 : i32
    return %c0_i32, %c0_i32_0 : i32, i32
  }
  func.func @transform_2(%arg0: i32) -> (i32, i32) {
    %c0_i32 = arith.constant 0 : i32
    %c0_i32_0 = arith.constant 0 : i32
    %c0_i32_1 = arith.constant 0 : i32
    return %c0_i32, %c0_i32_0 : i32, i32
  }
  func.func @transform_3(%arg0: i32) -> (i32, i32) {
    %c0_i32 = arith.constant 0 : i32
    %c0_i32_0 = arith.constant 0 : i32
    %c0_i32_1 = arith.constant 0 : i32
    return %c0_i32, %c0_i32_0 : i32, i32
  }
  func.func @transform_4(%arg0: i32) -> (i32, i32) {
    %c0_i32 = arith.constant 0 : i32
    %c0_i32_0 = arith.constant 0 : i32
    %c0_i32_1 = arith.constant 0 : i32
    return %c0_i32, %c0_i32_0 : i32, i32
  }
  func.func @transform_5(%arg0: i32) -> (i32, i32) {
    %c0_i32 = arith.constant 0 : i32
    %c0_i32_0 = arith.constant 0 : i32
    %c0_i32_1 = arith.constant 0 : i32
    return %c0_i32, %c0_i32_0 : i32, i32
  }
  func.func @transform_6(%arg0: i32) -> (i32, i32) {
    %c0_i32 = arith.constant 0 : i32
    %c0_i32_0 = arith.constant 0 : i32
    %c0_i32_1 = arith.constant 0 : i32
    return %c0_i32, %c0_i32_0 : i32, i32
  }
  func.func @transform_7(%arg0: i32) -> (i32, i32) {
    %c0_i32 = arith.constant 0 : i32
    %c0_i32_0 = arith.constant 0 : i32
    %c0_i32_1 = arith.constant 0 : i32
    return %c0_i32, %c0_i32_0 : i32, i32
  }
  func.func @transform_8(%arg0: i32) -> (i32, i32) {
    %c0_i32 = arith.constant 0 : i32
    %c0_i32_0 = arith.constant 0 : i32
    %c0_i32_1 = arith.constant 0 : i32
    return %c0_i32, %c0_i32_0 : i32, i32
  }
  func.func @transform_9(%arg0: i32) -> (i32, i32) {
    %c0_i32 = arith.constant 0 : i32
    %c0_i32_0 = arith.constant 0 : i32
    %c0_i32_1 = arith.constant 0 : i32
    return %c0_i32, %c0_i32_0 : i32, i32
  }
  func.func @transform_10(%arg0: i32) -> (i32, i32) {
    %c0_i32 = arith.constant 0 : i32
    %c0_i32_0 = arith.constant 0 : i32
    %c0_i32_1 = arith.constant 0 : i32
    return %c0_i32, %c0_i32_0 : i32, i32
  }
}

</mosaic_0001>

<bundles_post_ra>
// kernel: dense_block_forward.1
= control target key start
LH: loop header
LB: loop body
LE: loop exit
PB: predicated region body
PF: predicated region fallthrough
CT: control target
= control target key end

     0   :  { %v1624_v20 = vmov 0   ;;  %s1627_s12 = smov 15   ;;  %s1628_s13 = smov 1   ;;  %v1633_v42 = vmov 0.0   ;;  %v102_v44 = vlaneseq  ;;  %vm494_vm8 = vcmask 588800   ;;  %s2459_s0 = inlined_call_operand.vmem [shape: f32[8,512], index: 0, kind: input, shape index: {}]   ;;  %s2460_s10 = inlined_call_operand.vmem [shape: f32[24,512], index: 10, kind: output, shape index: {}]   ;;  %s2461_s2 = inlined_call_operand.vmem [shape: f32[8,1], index: 2, kind: input, shape index: {}]   ;;  %s2462_s3 = inlined_call_operand.vmem [shape: f32[8,1], index: 3, kind: input, shape index: {}]   ;;  %s2463_s5 = inlined_call_operand.vmem [shape: f32[8,1], index: 5, kind: input, shape index: {}]   ;;  %s2464_s1 = inlined_call_operand.vmem [shape: f32[9,512], index: 1, kind: input, shape index: {}]   ;;  %s2465_s4 = inlined_call_operand.vmem [shape: f32[8,72], index: 4, kind: input, shape index: {}]   ;;  %s2466_s6 = inlined_call_operand.vmem [shape: f32[16,1], index: 6, kind: input, shape index: {}]   ;;  %s2467_s7 = inlined_call_operand.vmem [shape: f32[16,1], index: 7, kind: input, shape index: {}]   ;;  %s2468_s9 = inlined_call_operand.vmem [shape: f32[8,1], index: 9, kind: input, shape index: {}]   ;;  %s2469_s8 = inlined_call_operand.vmem [shape: f32[8,144], index: 8, kind: input, shape index: {}]  }
   0x1   :  { %v1692_v0 = vld [vmem:[%s2459_s0] sm:$0xff]  ;;  %v1697_v1 = vld [vmem:[%s2459_s0 + $0x8] sm:$0xff]  ;;  %v1702_v2 = vld [vmem:[%s2459_s0 + $0x10] sm:$0xff]  ;;  %1616 = vset.pattern.permute.xlu1 %v1624_v20  ;;  %1617 = vset.pattern.permute.xlu0 %v1624_v20  ;;  %s1629_s14 = smov 127   ;;  %s1630_s15 = smov 113   ;;  %vm1330_vm9 = vcmask 130048  }
   0x2   :  { %v1707_v3 = vld [vmem:[%s2459_s0 + $0x18] sm:$0xff]  ;;  %39 = vst [vmem:[%s2460_s10] sm:$0xff] %v1692_v0  ;;  %40 = vst [vmem:[%s2460_s10 + $0x8] sm:$0xff] %v1697_v1  ;;  %v47_v4 = vadd.f32 %v1697_v1, %v1692_v0  ;;  %v67_v24 = vld [vmem:[%s2461_s2] sm:$0xff]  ;;  %s1625_s2 = smov 17   ;;  %s1631_s16 = smov 112   ;;  %562 = vmatprep.mubr.f32.mxu0 %v1633_v42  ;;  %633 = vmatprep.mubr.f32.mxu1 %v1633_v42  ;;  %v112_v45 = vshrl.u32 %v102_v44, 7 }
   0x3   :  { %41 = vst [vmem:[%s2460_s10 + $0x10] sm:$0xff] %v1702_v2  ;;  %42 = vst [vmem:[%s2460_s10 + $0x18] sm:$0xff] %v1707_v3  ;;  %v80_v27 = vld [vmem:[%s2462_s3] sm:$0xff]  ;;  %s1626_s3 = smov 16   ;;  %s1632_s17 = smov 111   ;;  %v1818_v47 = vand.u32 127, %v102_v44 }
   0x4   :  { %v48_v5 = vadd.f32 %v47_v4, %v1702_v2  ;;  %v488_v43 = vld [vmem:[%s2463_s5] sm:$0xff]  ;;  %v1820_v49 = vsub.s32 1, %v112_v45  ;;  %v1838_v60 = vsub.s32 0, %v112_v45 }
   0x5   :  { %v109_v50 = vld [vmem:[%s2464_s1] ss:$8 sm:$0xf]  ;;  %v1484_v51 = vld [vmem:[%s2464_s1 + $0x1] ss:$8 sm:$0xf] }
   0x6   :  { %v1729_v6 = vadd.f32 %v48_v5, %v1707_v3  ;;  %vm104_vm0 = vcmp.lt.s32.totalorder %v1818_v47, 17  ;;  %vm147_vm1 = vcmp.lt.s32.totalorder %v1818_v47, 16  ;;  %v118_v54 = vrot.slane %v109_v50, %v1820_v49 }
   0x7   :  { %v162_v55 = vrot.slane %v1484_v51, %v1820_v49  ;;  %vm191_vm2 = vcmp.lt.s32.totalorder %v1818_v47, 15  ;;  %vm235_vm3 = vcmp.lt.s32.totalorder %v1818_v47, 1  ;;  %vm283_vm4 = vcmp.lt.s32.totalorder %v1818_v47, 127 }
   0x8   :  { %50 = vadd.xlane.f32.xlu0 %v1729_v6  ;;  %vm327_vm5 = vcmp.lt.s32.totalorder %v1818_v47, 113  ;;  %vm371_vm6 = vcmp.lt.s32.totalorder %v1818_v47, 112  ;;  %vm415_vm7 = vcmp.lt.s32.totalorder %v1818_v47, 111 }
  0x95   :  { %v51_v7 = vpop.xlane.xlu0 %50 }
  0x96   :  { %v52_v8 = vmul.f32 0.001953125, %v51_v7  ;;  %v1842_v7 = vsub.s32 3, %v112_v45 }
  0x98   :  { %v53_v9 = vsub.f32 %v1692_v0, %v52_v8  ;;  %v54_v10 = vsub.f32 %v1697_v1, %v52_v8  ;;  %v55_v11 = vsub.f32 %v1702_v2, %v52_v8  ;;  %v56_v12 = vsub.f32 %v1707_v3, %v52_v8 }
  0x99   :  { %v114_v8 = vrot.slane %v109_v50, %v1838_v60 }
  0x9a   :  { %v57_v13 = vmul.f32 %v53_v9, %v53_v9  ;;  %v58_v14 = vmul.f32 %v54_v10, %v54_v10  ;;  %v59_v15 = vmul.f32 %v55_v11, %v55_v11  ;;  %v60_v17 = vmul.f32 %v56_v12, %v56_v12 }
  0x9c   :  { %v61_v16 = vadd.f32 %v58_v14, %v57_v13  ;;  %v170_v14 = vrot.slane %v1484_v51, %v1842_v7 }
  0x9e   :  { %v62_v18 = vadd.f32 %v61_v16, %v59_v15 }
  0xa0   :  { %v63_v19 = vadd.f32 %v62_v18, %v60_v17  ;;  %v126_v18 = vrot.slane %v109_v50, %v1842_v7 }
  0xa2   :  { %64 = vadd.xlane.f32.xlu0 %v63_v19 }
 0x12f   :  { %v65_v21 = vpop.xlane.xlu0 %64 }
 0x130   :  { %v66_v22 = vmul.f32 0.001953125, %v65_v21 }
 0x132   :  { %v68_v23 = vadd.f32 1e-05, %v66_v22 }
 0x134   :  { %1618 = vrsqrt.f32 %v68_v23 }
 0x13e   :  { %v1619_v25 = vpop.eup %1618 }
 0x13f   :  { %v70_v26 = vmul.f32 %v1619_v25, %v67_v24 }
 0x141   :  { %73 = vperm.xlu1 %1616, %v70_v26  }
 0x145   :  { %83 = vperm.xlu1 %1616, %v80_v27  }
 0x1c0   :  { %v74_v28 = vpop.permute.xlu1 %73 }
 0x1c1   :  { %v76_v29 = vmul.f32 %v74_v28, %v53_v9  ;;  %v77_v30 = vmul.f32 %v74_v28, %v54_v10  ;;  %v78_v32 = vmul.f32 %v74_v28, %v55_v11  ;;  %v79_v39 = vmul.f32 %v74_v28, %v56_v12 }
 0x1c2   :  { %v158_v9 = vrot.slane %v1484_v51, %v1838_v60 }
 0x1c4   :  { %v84_v31 = vpop.permute.xlu1 %83 }
 0x1c5   :  { %v86_v33 = vadd.f32 %v84_v31, %v76_v29  ;;  %v87_v34 = vadd.f32 %v84_v31, %v77_v30  ;;  %v88_v35 = vadd.f32 %v84_v31, %v78_v32  ;;  %v89_v40 = vadd.f32 %v84_v31, %v79_v39  ;;  %v1485_v31 = vld [vmem:[%s2464_s1 + $0x2] ss:$8 sm:$0xf]  ;;  %v1486_v39 = vld [vmem:[%s2464_s1 + $0x3] ss:$8 sm:$0xf] }
 0x1c6   :  { %v250_v42 = vrot.slane %v1486_v39, %v1820_v49 }
 0x1c7   :  { %v1742_v36 = vmax.f32 %v86_v33, 0.0  ;;  %v1744_v37 = vmax.f32 %v87_v34, 0.0  ;;  %v1750_v38 = vmax.f32 %v88_v35, 0.0  ;;  %v1760_v41 = vmax.f32 %v89_v40, 0.0 }
 0x1c8   :  { %v206_v40 = vrot.slane %v1485_v31, %v1820_v49 }
 0x1c9   :  { %96 = vrot.lane.b32.xlu1 %v1744_v37, %s1625_s2  ;;  %94 = vrot.lane.b32.xlu0 %v1742_v36, %s1625_s2 }
 0x1cd   :  { %139 = vrot.lane.b32.xlu1 %v1742_v36, %s1626_s3  ;;  %143 = vrot.lane.b32.xlu0 %v1750_v38, %s1626_s3 }
 0x1d1   :  { %141 = vrot.lane.b32.xlu1 %v1744_v37, %s1626_s3  ;;  %185 = vrot.lane.b32.xlu0 %v1744_v37, %s1627_s12 }
 0x1d5   :  { %100 = vrot.lane.b32.xlu1 %v1760_v41, %s1625_s2  ;;  %229 = vrot.lane.b32.xlu0 %v1744_v37, %s1628_s13 }
 0x1d9   :  { %145 = vrot.lane.b32.xlu1 %v1760_v41, %s1626_s3  ;;  %233 = vrot.lane.b32.xlu0 %v1760_v41, %s1628_s13 }
 0x1dd   :  { %98 = vrot.lane.b32.xlu1 %v1750_v38, %s1625_s2  ;;  %231 = vrot.lane.b32.xlu0 %v1750_v38, %s1628_s13 }
 0x1e1   :  { %183 = vrot.lane.b32.xlu1 %v1742_v36, %s1627_s12  ;;  %279 = vrot.lane.b32.xlu0 %v1750_v38, %s1629_s14 }
 0x1e5   :  { %227 = vrot.lane.b32.xlu1 %v1742_v36, %s1628_s13  ;;  %281 = vrot.lane.b32.xlu0 %v1760_v41, %s1629_s14 }
 0x1e9   :  { %189 = vrot.lane.b32.xlu1 %v1760_v41, %s1627_s12  ;;  %323 = vrot.lane.b32.xlu0 %v1750_v38, %s1630_s15 }
 0x1ed   :  { %187 = vrot.lane.b32.xlu1 %v1750_v38, %s1627_s12  ;;  %367 = vrot.lane.b32.xlu0 %v1750_v38, %s1631_s16 }
 0x1f1   :  { %277 = vrot.lane.b32.xlu1 %v1744_v37, %s1629_s14  ;;  %363 = vrot.lane.b32.xlu0 %v1742_v36, %s1631_s16 }
 0x1f5   :  { %275 = vrot.lane.b32.xlu1 %v1742_v36, %s1629_s14  ;;  %369 = vrot.lane.b32.xlu0 %v1760_v41, %s1631_s16 }
 0x1f9   :  { %321 = vrot.lane.b32.xlu1 %v1744_v37, %s1630_s15  ;;  %411 = vrot.lane.b32.xlu0 %v1750_v38, %s1632_s17 }
 0x1fd   :  { %365 = vrot.lane.b32.xlu1 %v1744_v37, %s1631_s16  ;;  %413 = vrot.lane.b32.xlu0 %v1760_v41, %s1632_s17 }
 0x201   :  { %319 = vrot.lane.b32.xlu1 %v1742_v36, %s1630_s15 }
 0x205   :  { %325 = vrot.lane.b32.xlu1 %v1760_v41, %s1630_s15 }
 0x209   :  { %409 = vrot.lane.b32.xlu1 %v1744_v37, %s1632_s17 }
 0x20d   :  { %407 = vrot.lane.b32.xlu1 %v1742_v36, %s1632_s17 }
 0x211   :  { %491 = vperm.xlu1 %1616, %v488_v43  }
 0x21c   :  { %655 = vadd.xlane.f32.xlu0 %v1729_v6  ;;  %v1840_v6 = vsub.s32 2, %v112_v45 }
 0x21e   :  { %v166_v15 = vrot.slane %v1484_v51, %v1840_v6  ;;  %v122_v19 = vrot.slane %v109_v50, %v1840_v6  ;;  %v246_v50 = vrot.slane %v1486_v39, %v1838_v60 }
 0x23b   :  { %v97_v46 = vpop.permute.xlu1 %96  ;;  %v95_v48 = vpop.permute.xlu0 %94 }
 0x23c   :  { %v107_v56 = vsel %vm104_vm0, %v95_v48, %v97_v46 }
 0x23d   :  { %v132_v61 = vmul.f32 %v118_v54, %v107_v56  ;;  %v254_v56 = vrot.slane %v1486_v39, %v1840_v6 }
 0x23f   :  { %v140_v52 = vpop.permute.xlu1 %139  ;;  %v144_v53 = vpop.permute.xlu0 %143 }
 0x243   :  { %v142_v57 = vpop.permute.xlu1 %141  ;;  %v1834_v58 = vpop.permute.xlu0 %185 }
 0x244   :  { %v150_v59 = vsel %vm147_vm1, %v140_v52, %v142_v57  ;;  %v149_v20 = vsel %vm147_vm1, %v142_v57, %v144_v53  ;;  %v258_v57 = vrot.slane %v1486_v39, %v1842_v7 }
 0x245   :  { %v176_v62 = vmul.f32 %v162_v55, %v150_v59  ;;  %v177_v30 = vmul.f32 %v166_v15, %v149_v20 }
 0x247   :  { %v101_v63 = vpop.permute.xlu1 %100  ;;  %v230_v4 = vpop.permute.xlu0 %229  ;;  %v1502_v5 = vpack.c.bf16 %v176_v62, %v132_v61 }
 0x248   :  { %v108_v10 = vsel %vm104_vm0, %v101_v63, %v95_v48 }
 0x249   :  { %1503 = vmatprep.subr.bf16.mxu0 %v1502_v5  ;;  %v131_v16 = vmul.f32 %v114_v8, %v108_v10  ;;  %v214_v5 = vrot.slane %v1485_v31, %v1842_v7 }
 0x24b   :  { %v146_v11 = vpop.permute.xlu1 %145  ;;  %v234_v12 = vpop.permute.xlu0 %233 }
 0x24c   :  { %v151_v13 = vsel %vm147_vm1, %v146_v11, %v140_v52  ;;  %v148_v21 = vsel %vm147_vm1, %v144_v53, %v146_v11  ;;  %v202_v52 = vrot.slane %v1485_v31, %v1838_v60  ;;  %v1487_v11 = vld [vmem:[%s2464_s1 + $0x5] ss:$8 sm:$0xf] }
 0x24d   :  { %v175_v17 = vmul.f32 %v158_v9, %v151_v13  ;;  %v178_v28 = vmul.f32 %v170_v14, %v148_v21 }
 0x24f   :  { %v99_v22 = vpop.permute.xlu1 %98  ;;  %v232_v23 = vpop.permute.xlu0 %231  ;;  %v1504_v24 = vpack.c.bf16 %v175_v17, %v131_v16 }
 0x250   :  { %v106_v25 = vsel %vm104_vm0, %v97_v46, %v99_v22  ;;  %v105_v26 = vsel %vm104_vm0, %v99_v22, %v101_v63  ;;  %v210_v63 = vrot.slane %v1485_v31, %v1840_v6  ;;  %v236_v8 = vsel %vm235_vm3, %v232_v23, %v234_v12 }
 0x251   :  { %1505 = vmatpush1.bf16.msra.mxu0 %v1504_v24  ;;  %v134_v27 = vmul.f32 %v126_v18, %v105_v26  ;;  %v133_v29 = vmul.f32 %v122_v19, %v106_v25  ;;  %v237_v9 = vsel %vm235_vm3, %v230_v4, %v232_v23  ;;  %v266_v18 = vmul.f32 %v258_v57, %v236_v8 }
 0x252   :  { %v265_v17 = vmul.f32 %v254_v56, %v237_v9  ;;  %v302_v23 = vrot.slane %v1487_v11, %v1840_v6 }
 0x253   :  { %v184_v32 = vpop.permute.xlu1 %183  ;;  %v280_v33 = vpop.permute.xlu0 %279  ;;  %v1518_v34 = vpack.c.bf16 %v178_v28, %v134_v27  ;;  %v1520_v35 = vpack.c.bf16 %v177_v30, %v133_v29  ;;  %v294_v27 = vrot.slane %v1487_v11, %v1838_v60  ;;  %v306_v28 = vrot.slane %v1487_v11, %v1842_v7 }
 0x254   :  { %v194_v43 = vsel %vm191_vm2, %v184_v32, %v1834_v58 }
 0x255   :  { %1519 = vmatprep.subr.bf16.mxu1 %v1518_v34  ;;  %v220_v48 = vmul.f32 %v206_v40, %v194_v43  ;;  %v1488_v40 = vld [vmem:[%s2464_s1 + $0x6] ss:$8 sm:$0xf] }
 0x256   :  { %1521 = vmatpush1.bf16.msra.mxu1 %v1520_v35  ;;  %v346_v8 = vrot.slane %v1488_v40, %v1840_v6  ;;  %v350_v9 = vrot.slane %v1488_v40, %v1842_v7 }
 0x257   :  { %v228_v44 = vpop.permute.xlu1 %227  ;;  %v282_v46 = vpop.permute.xlu0 %281 }
 0x258   :  { %v238_v45 = vsel %vm235_vm3, %v228_v44, %v230_v4  ;;  %v239_v53 = vsel %vm235_vm3, %v234_v12, %v228_v44  ;;  %v298_v12 = vrot.slane %v1487_v11, %v1820_v49  ;;  %v1489_v44 = vld [vmem:[%s2464_s1 + $0x7] ss:$8 sm:$0xf] }
 0x259   :  { %v264_v51 = vmul.f32 %v250_v42, %v238_v45  ;;  %v263_v61 = vmul.f32 %v246_v50, %v239_v53 }
 0x25b   :  { %v190_v54 = vpop.permute.xlu1 %189  ;;  %v1506_v55 = vpack.c.bf16 %v264_v51, %v220_v48  ;;  %v1891_v10 = vpop.permute.xlu0 %323  ;;  %v386_v48 = vrot.slane %v1489_v44, %v1820_v49 }
 0x25c   :  { %v195_v59 = vsel %vm191_vm2, %v190_v54, %v184_v32 }
 0x25d   :  { %v219_v62 = vmul.f32 %v202_v52, %v195_v59  ;;  %1507 = vmatprep.subr.bf16.mxu0 %v1506_v55  ;;  %v390_v59 = vrot.slane %v1489_v44, %v1840_v6 }
 0x25f   :  { %v188_v13 = vpop.permute.xlu1 %187  ;;  %v1508_v14 = vpack.c.bf16 %v263_v61, %v219_v62  ;;  %v368_v24 = vpop.permute.xlu0 %367  ;;  %v394_v61 = vrot.slane %v1489_v44, %v1842_v7 }
 0x260   :  { %v192_v15 = vsel %vm191_vm2, %v188_v13, %v190_v54  ;;  %v193_v16 = vsel %vm191_vm2, %v1834_v58, %v188_v13  ;;  %v284_v58 = vsel %vm283_vm4, %v280_v33, %v282_v46  ;;  %v338_v54 = vrot.slane %v1488_v40, %v1838_v60 }
 0x261   :  { %v221_v4 = vmul.f32 %v210_v63, %v193_v16  ;;  %v222_v19 = vmul.f32 %v214_v5, %v192_v15  ;;  %1509 = vmatpush1.bf16.msra.mxu0 %v1508_v14  ;;  %v313_v31 = vmul.f32 %v302_v23, %v284_v58  ;;  %v1490_v15 = vld [vmem:[%s2464_s1 + $0x20] ss:$8 sm:$0xf] }
 0x263   :  { %v278_v20 = vpop.permute.xlu1 %277  ;;  %v1522_v21 = vpack.c.bf16 %v266_v18, %v222_v19  ;;  %v1524_v22 = vpack.c.bf16 %v265_v17, %v221_v4  ;;  %v1528_v45 = vpack.c.bf16 %v313_v31, %v1750_v38  ;;  %v382_v38 = vrot.slane %v1489_v44, %v1838_v60 }
 0x264   :  { %v285_v25 = vsel %vm283_vm4, %v278_v20, %v280_v33  ;;  %v364_v33 = vpop.permute.xlu0 %363  ;;  %v430_v4 = vrot.slane %v1490_v15, %v1820_v49 }
 0x265   :  { %v312_v26 = vmul.f32 %v298_v12, %v285_v25  ;;  %1523 = vmatprep.subr.bf16.mxu1 %v1522_v21 }
 0x266   :  { %1525 = vmatpush1.bf16.msra.mxu1 %v1524_v22 }
 0x267   :  { %v276_v29 = vpop.permute.xlu1 %275  ;;  %v1510_v30 = vpack.c.bf16 %v312_v26, %v1744_v37 }
 0x268   :  { %v286_v32 = vsel %vm283_vm4, %v276_v29, %v278_v20  ;;  %v287_v34 = vsel %vm283_vm4, %v282_v46, %v276_v29  ;;  %v342_v46 = vrot.slane %v1488_v40, %v1820_v49  ;;  %v434_v29 = vrot.slane %v1490_v15, %v1840_v6 }
 0x269   :  { %v311_v35 = vmul.f32 %v294_v27, %v286_v32  ;;  %v314_v39 = vmul.f32 %v306_v28, %v287_v34  ;;  %1511 = vmatprep.subr.bf16.mxu0 %v1510_v30  ;;  %v426_v27 = vrot.slane %v1490_v15, %v1838_v60  ;;  %v438_v28 = vrot.slane %v1490_v15, %v1842_v7  ;;  %v719_v15 = vld [vmem:[%s2467_s7 + $0x8] sm:$0xff] }
 0x26b   :  { %v322_v42 = vpop.permute.xlu1 %321  ;;  %v1512_v37 = vpack.c.bf16 %v311_v35, %v1742_v36  ;;  %v1526_v43 = vpack.c.bf16 %v314_v39, %v1760_v41  ;;  %v370_v41 = vpop.permute.xlu0 %369 }
 0x26c   :  { %v329_v50 = vsel %vm327_vm5, %v322_v42, %v1891_v10  ;;  %v372_v11 = vsel %vm371_vm6, %v368_v24, %v370_v41  ;;  %v375_v13 = vsel %vm371_vm6, %v370_v41, %v364_v33 }
 0x26d   :  { %1513 = vmatpush1.bf16.msra.mxu0 %v1512_v37  ;;  %1527 = vmatprep.subr.bf16.mxu1 %v1526_v43  ;;  %v356_v52 = vmul.f32 %v342_v46, %v329_v50  ;;  %v401_v19 = vmul.f32 %v390_v59, %v372_v11  ;;  %v402_v20 = vmul.f32 %v394_v61, %v375_v13  ;;  %v692_v11 = vld [vmem:[%s2466_s6] sm:$0xff] }
 0x26e   :  { %1529 = vmatpush1.bf16.msra.mxu1 %v1528_v45 }
 0x26f   :  { %v366_v36 = vpop.permute.xlu1 %365  ;;  %v412_v14 = vpop.permute.xlu0 %411 }
 0x270   :  { %v373_v51 = vsel %vm371_vm6, %v366_v36, %v368_v24  ;;  %v374_v55 = vsel %vm371_vm6, %v364_v33, %v366_v36  ;;  %v451_v33 = vld [vmem:[%s2465_s4] sm:$0xff] }
 0x271   :  { %v400_v53 = vmul.f32 %v386_v48, %v373_v51  ;;  %v399_v63 = vmul.f32 %v382_v38, %v374_v55 }
 0x273   :  { %v320_v56 = vpop.permute.xlu1 %319  ;;  %v1514_v57 = vpack.c.bf16 %v400_v53, %v356_v52  ;;  %v414_v58 = vpop.permute.xlu0 %413 }
 0x274   :  { %v330_v62 = vsel %vm327_vm5, %v320_v56, %v322_v42  ;;  %v416_v30 = vsel %vm415_vm7, %v412_v14, %v414_v58 }
 0x275   :  { %v355_v5 = vmul.f32 %v338_v54, %v330_v62  ;;  %1515 = vmatprep.subr.bf16.mxu0 %v1514_v57  ;;  %v445_v40 = vmul.f32 %v434_v29, %v416_v30 }
 0x277   :  { %v326_v16 = vpop.permute.xlu1 %325  ;;  %v1516_v12 = vpack.c.bf16 %v399_v63, %v355_v5 }
 0x278   :  { %v328_v17 = vsel %vm327_vm5, %v1891_v10, %v326_v16  ;;  %v331_v18 = vsel %vm327_vm5, %v326_v16, %v320_v56 }
 0x279   :  { %v357_v21 = vmul.f32 %v346_v8, %v328_v17  ;;  %v358_v22 = vmul.f32 %v350_v9, %v331_v18  ;;  %1517 = vmatpush1.bf16.msra.mxu0 %v1516_v12 }
 0x27b   :  { %v410_v23 = vpop.permute.xlu1 %409  ;;  %v1530_v24 = vpack.c.bf16 %v402_v20, %v358_v22  ;;  %v1532_v25 = vpack.c.bf16 %v401_v19, %v357_v21 }
 0x27c   :  { %v417_v26 = vsel %vm415_vm7, %v410_v23, %v412_v14  ;;  %v718_v14 = vld [vmem:[%s2467_s7] sm:$0xff] }
 0x27d   :  { %v444_v10 = vmul.f32 %v430_v4, %v417_v26  ;;  %1531 = vmatprep.subr.bf16.mxu1 %v1530_v24 }
 0x27e   :  { %1533 = vmatpush1.bf16.msra.mxu1 %v1532_v25 }
 0x27f   :  { %v408_v31 = vpop.permute.xlu1 %407  ;;  %514 = vmatprep.subr.mxu0 %v444_v10 }
 0x280   :  { %v418_v32 = vsel %vm415_vm7, %v408_v31, %v410_v23  ;;  %v419_v34 = vsel %vm415_vm7, %v414_v58, %v408_v31 }
 0x281   :  { %v443_v35 = vmul.f32 %v426_v27, %v418_v32  ;;  %v446_v39 = vmul.f32 %v438_v28, %v419_v34 }
 0x283   :  { %515 = vmatpush1.msra.mxu0 %v443_v35  ;;  %585 = vmatprep.subr.mxu1 %v446_v39 }
 0x284   :  { %1491 = vmatmul.mubr.msk.f32.vlgmr.msra.gmra.mrb[0].mxu0 %vm494_vm8, %v451_v33  ;;  %586 = vmatpush1.msra.mxu1 %v445_v40 }
 0x285   :  { %1492 = vmatmul.mubr.msk.f32.vlgmr.msra.gmra.mrb[0].mxu1 %vm494_vm8, %v451_v33 }
 0x290   :  { %v492_v54 = vpop.permute.xlu1 %491 }
 0x2a9   :  { %v656_v42 = vpop.xlane.xlu0 %655 }
 0x2aa   :  { %v662_v37 = vmul.f32 0.001953125, %v656_v42 }
 0x2ac   :  { %v664_v43 = vsub.f32 %v1692_v0, %v662_v37  ;;  %v665_v44 = vsub.f32 %v1697_v1, %v662_v37  ;;  %v666_v45 = vsub.f32 %v1702_v2, %v662_v37  ;;  %v1975_v46 = vsub.f32 %v1707_v3, %v662_v37 }
 0x2ae   :  { %v672_v48 = vmul.f32 %v664_v43, %v664_v43  ;;  %v673_v50 = vmul.f32 %v665_v44, %v665_v44  ;;  %v674_v36 = vmul.f32 %v666_v45, %v666_v45  ;;  %v675_v41 = vmul.f32 %v1975_v46, %v1975_v46 }
 0x2b0   :  { %v680_v51 = vadd.f32 %v673_v50, %v672_v48 }
 0x2b2   :  { %v681_v52 = vadd.f32 %v680_v51, %v674_v36 }
 0x2b4   :  { %v682_v38 = vadd.f32 %v681_v52, %v675_v41 }
 0x2b6   :  { %683 = vadd.xlane.f32.xlu0 %v682_v38 }
 0x343   :  { %v684_v53 = vpop.xlane.xlu0 %683 }
 0x344   :  { %v690_v59 = vmul.f32 0.001953125, %v684_v53 }
 0x346   :  { %v694_v63 = vadd.f32 1e-05, %v690_v59 }
 0x348   :  { %1620 = vrsqrt.f32 %v694_v63 }
 0x352   :  { %v1621_v9 = vpop.eup %1620 }
 0x353   :  { %v698_v13 = vmul.f32 %v1621_v9, %v692_v11 }
 0x357   :  { %v564_v0 = vpop.f32.mrb[0].mxu0 }
 0x358   :  { %v565_v55 = vadd.f32 %v564_v0, %v492_v54  ;;  %v566_v1 = vpop.f32.mrb[1].mxu0  ;;  %v635_v56 = vpop.f32.mrb[0].mxu1 }
 0x359   :  { %v567_v2 = vadd.f32 %v566_v1, %v492_v54  ;;  %v636_v57 = vadd.f32 %v635_v56, %v492_v54  ;;  %v637_v3 = vpop.f32.mrb[1].mxu1 }
 0x35a   :  { %640 = vst [vmem:[%s2460_s10 + $0x20] sm:$0xff] %v565_v55  ;;  %v638_v61 = vadd.f32 %v637_v3, %v492_v54 }
 0x35b   :  { %641 = vst [vmem:[%s2460_s10 + $0x28] sm:$0xff] %v567_v2  ;;  %642 = vst [vmem:[%s2460_s10 + $0x30] sm:$0xff] %v636_v57  ;;  %v657_v62 = vadd.f32 %v567_v2, %v565_v55 }
 0x35c   :  { %643 = vst [vmem:[%s2460_s10 + $0x38] sm:$0xff] %v638_v61 }
 0x35d   :  { %v658_v5 = vadd.f32 %v657_v62, %v636_v57 }
 0x35f   :  { %v659_v8 = vadd.f32 %v658_v5, %v638_v61  ;;  %v693_v5 = vld [vmem:[%s2466_s6 + $0x8] sm:$0xff] }
 0x361   :  { %660 = vadd.xlane.f32.xlu1 %v659_v8 }
 0x372   :  { %702 = vperm.xlu1 %1616, %v698_v13  }
 0x376   :  { %722 = vperm.xlu1 %1616, %v718_v14  }
 0x37a   :  { %727 = vperm.xlu1 %1616, %v719_v15  }
 0x3ee   :  { %v661_v16 = vpop.xlane.xlu1 %660 }
 0x3ef   :  { %v663_v12 = vmul.f32 0.001953125, %v661_v16 }
 0x3f1   :  { %v2000_v17 = vsub.f32 %v565_v55, %v663_v12  ;;  %v2002_v18 = vsub.f32 %v567_v2, %v663_v12  ;;  %v2004_v19 = vsub.f32 %v636_v57, %v663_v12  ;;  %v2006_v20 = vsub.f32 %v638_v61, %v663_v12 }
 0x3f2   :  { %v703_v4 = vpop.permute.xlu1 %702 }
 0x3f3   :  { %v676_v21 = vmul.f32 %v2000_v17, %v2000_v17  ;;  %v677_v22 = vmul.f32 %v2002_v18, %v2002_v18  ;;  %v710_v23 = vmul.f32 %v703_v4, %v664_v43  ;;  %v678_v25 = vmul.f32 %v2004_v19, %v2004_v19 }
 0x3f4   :  { %v711_v26 = vmul.f32 %v703_v4, %v665_v44  ;;  %v679_v27 = vmul.f32 %v2006_v20, %v2006_v20  ;;  %v712_v32 = vmul.f32 %v703_v4, %v666_v45  ;;  %v713_v39 = vmul.f32 %v703_v4, %v1975_v46 }
 0x3f5   :  { %v685_v58 = vadd.f32 %v677_v22, %v676_v21 }
 0x3f6   :  { %v723_v24 = vpop.permute.xlu1 %722 }
 0x3f7   :  { %v730_v10 = vadd.f32 %v723_v24, %v710_v23  ;;  %v686_v28 = vadd.f32 %v685_v58, %v678_v25  ;;  %v731_v29 = vadd.f32 %v723_v24, %v711_v26  ;;  %v732_v34 = vadd.f32 %v723_v24, %v712_v32 }
 0x3f8   :  { %v733_v33 = vadd.f32 %v723_v24, %v713_v39 }
 0x3f9   :  { %v2016_v30 = vmax.f32 %v730_v10, 0.0  ;;  %v687_v31 = vadd.f32 %v686_v28, %v679_v27  ;;  %v2020_v35 = vmax.f32 %v731_v29, 0.0  ;;  %v2025_v40 = vmax.f32 %v732_v34, 0.0 }
 0x3fa   :  { %v2029_v42 = vmax.f32 %v733_v33, 0.0  ;;  %v728_v37 = vpop.permute.xlu1 %727 }
 0x3fb   :  { %746 = vrot.lane.b32.xlu1 %v2016_v30, %s1625_s2  ;;  %688 = vadd.xlane.f32.xlu0 %v687_v31 }
 0x3ff   :  { %750 = vrot.lane.b32.xlu1 %v2020_v35, %s1625_s2 }
 0x403   :  { %754 = vrot.lane.b32.xlu1 %v2025_v40, %s1625_s2 }
 0x407   :  { %758 = vrot.lane.b32.xlu1 %v2029_v42, %s1625_s2 }
 0x40b   :  { %808 = vrot.lane.b32.xlu1 %v2016_v30, %s1626_s3 }
 0x40f   :  { %812 = vrot.lane.b32.xlu1 %v2020_v35, %s1626_s3 }
 0x413   :  { %816 = vrot.lane.b32.xlu1 %v2025_v40, %s1626_s3 }
 0x417   :  { %820 = vrot.lane.b32.xlu1 %v2029_v42, %s1626_s3 }
 0x41b   :  { %870 = vrot.lane.b32.xlu1 %v2016_v30, %s1627_s12 }
 0x41f   :  { %874 = vrot.lane.b32.xlu1 %v2020_v35, %s1627_s12 }
 0x423   :  { %878 = vrot.lane.b32.xlu1 %v2025_v40, %s1627_s12 }
 0x427   :  { %882 = vrot.lane.b32.xlu1 %v2029_v42, %s1627_s12 }
 0x42b   :  { %932 = vrot.lane.b32.xlu1 %v2016_v30, %s1628_s13 }
 0x42f   :  { %936 = vrot.lane.b32.xlu1 %v2020_v35, %s1628_s13 }
 0x433   :  { %940 = vrot.lane.b32.xlu1 %v2025_v40, %s1628_s13 }
 0x437   :  { %944 = vrot.lane.b32.xlu1 %v2029_v42, %s1628_s13 }
 0x43b   :  { %1002 = vrot.lane.b32.xlu1 %v2016_v30, %s1629_s14 }
 0x43f   :  { %1006 = vrot.lane.b32.xlu1 %v2020_v35, %s1629_s14 }
 0x443   :  { %1010 = vrot.lane.b32.xlu1 %v2025_v40, %s1629_s14 }
 0x447   :  { %1014 = vrot.lane.b32.xlu1 %v2029_v42, %s1629_s14 }
 0x44b   :  { %1064 = vrot.lane.b32.xlu1 %v2016_v30, %s1630_s15 }
 0x44f   :  { %1068 = vrot.lane.b32.xlu1 %v2020_v35, %s1630_s15 }
 0x453   :  { %1072 = vrot.lane.b32.xlu1 %v2025_v40, %s1630_s15 }
 0x457   :  { %1076 = vrot.lane.b32.xlu1 %v2029_v42, %s1630_s15 }
 0x46d   :  { %v747_v43 = vpop.permute.xlu1 %746 }
 0x471   :  { %v751_v44 = vpop.permute.xlu1 %750 }
 0x472   :  { %v2075_v45 = vsel %vm104_vm0, %v747_v43, %v751_v44 }
 0x475   :  { %v755_v46 = vpop.permute.xlu1 %754 }
 0x476   :  { %v2079_v48 = vsel %vm104_vm0, %v751_v44, %v755_v46 }
 0x479   :  { %v759_v50 = vpop.permute.xlu1 %758 }
 0x47a   :  { %v2083_v36 = vsel %vm104_vm0, %v755_v46, %v759_v50  ;;  %v2087_v41 = vsel %vm104_vm0, %v759_v50, %v747_v43 }
 0x47d   :  { %v809_v51 = vpop.permute.xlu1 %808 }
 0x481   :  { %v813_v52 = vpop.permute.xlu1 %812 }
 0x482   :  { %v2091_v38 = vsel %vm147_vm1, %v809_v51, %v813_v52 }
 0x485   :  { %v817_v53 = vpop.permute.xlu1 %816 }
 0x486   :  { %v2095_v54 = vsel %vm147_vm1, %v813_v52, %v817_v53 }
 0x488   :  { %v689_v0 = vpop.xlane.xlu0 %688 }
 0x489   :  { %v821_v55 = vpop.permute.xlu1 %820  ;;  %v691_v1 = vmul.f32 0.001953125, %v689_v0 }
 0x48a   :  { %v2099_v56 = vsel %vm147_vm1, %v817_v53, %v821_v55  ;;  %v2103_v2 = vsel %vm147_vm1, %v821_v55, %v809_v51 }
 0x48b   :  { %v695_v57 = vadd.f32 1e-05, %v691_v1 }
 0x48d   :  { %v871_v3 = vpop.permute.xlu1 %870  ;;  %1622 = vrsqrt.f32 %v695_v57 }
 0x491   :  { %v875_v59 = vpop.permute.xlu1 %874 }
 0x492   :  { %v2107_v61 = vsel %vm191_vm2, %v871_v3, %v875_v59 }
 0x495   :  { %v879_v62 = vpop.permute.xlu1 %878 }
 0x496   :  { %v2111_v63 = vsel %vm191_vm2, %v875_v59, %v879_v62  ;;  %v770_v59 = vld [vmem:[%s2464_s1] ss:$8 sm:$0xf] }
 0x497   :  { %v1623_v8 = vpop.eup %1622 }
 0x498   :  { %v699_v11 = vmul.f32 %v1623_v8, %v693_v5  ;;  %v783_v5 = vrot.slane %v770_v59, %v1840_v6  ;;  %v775_v8 = vrot.slane %v770_v59, %v1838_v60 }
 0x499   :  { %v883_v9 = vpop.permute.xlu1 %882 }
 0x49a   :  { %v2118_v13 = vsel %vm191_vm2, %v879_v62, %v883_v9  ;;  %v2122_v14 = vsel %vm191_vm2, %v883_v9, %v871_v3  ;;  %707 = vperm.xlu0 %1617, %v699_v11   ;;  %v779_v62 = vrot.slane %v770_v59, %v1820_v49  ;;  %v787_v9 = vrot.slane %v770_v59, %v1842_v7 }
 0x49d   :  { %v933_v15 = vpop.permute.xlu1 %932 }
 0x4a1   :  { %v937_v16 = vpop.permute.xlu1 %936 }
 0x4a2   :  { %v2126_v12 = vsel %vm235_vm3, %v933_v15, %v937_v16 }
 0x4a5   :  { %v941_v4 = vpop.permute.xlu1 %940 }
 0x4a6   :  { %v2130_v21 = vsel %vm235_vm3, %v937_v16, %v941_v4  ;;  %v793_v16 = vmul.f32 %v779_v62, %v2075_v45 }
 0x4a9   :  { %v945_v22 = vpop.permute.xlu1 %944 }
 0x4aa   :  { %v2134_v23 = vsel %vm235_vm3, %v941_v4, %v945_v22  ;;  %v2138_v24 = vsel %vm235_vm3, %v945_v22, %v933_v15  ;;  %v794_v4 = vmul.f32 %v783_v5, %v2079_v48  ;;  %v792_v22 = vmul.f32 %v775_v8, %v2087_v41 }
 0x4ad   :  { %v1003_v25 = vpop.permute.xlu1 %1002 }
 0x4b1   :  { %v1007_v58 = vpop.permute.xlu1 %1006 }
 0x4b2   :  { %v2142_v26 = vsel %vm283_vm4, %v1003_v25, %v1007_v58 }
 0x4b5   :  { %v1011_v10 = vpop.permute.xlu1 %1010 }
 0x4b6   :  { %v2146_v27 = vsel %vm283_vm4, %v1007_v58, %v1011_v10 }
 0x4b9   :  { %v1015_v28 = vpop.permute.xlu1 %1014 }
 0x4ba   :  { %v2150_v29 = vsel %vm283_vm4, %v1011_v10, %v1015_v28  ;;  %v2154_v31 = vsel %vm283_vm4, %v1015_v28, %v1003_v25  ;;  %v795_v25 = vmul.f32 %v787_v9, %v2083_v36  ;;  %v1493_v36 = vld [vmem:[%s2464_s1 + $0x1] ss:$8 sm:$0xf] }
 0x4bd   :  { %v2156_v32 = vpop.permute.xlu1 %1064 }
 0x4c1   :  { %v1069_v34 = vpop.permute.xlu1 %1068 }
 0x4c2   :  { %v2161_v39 = vsel %vm327_vm5, %v2156_v32, %v1069_v34 }
 0x4c5   :  { %v2163_v33 = vpop.permute.xlu1 %1072 }
 0x4c6   :  { %v2168_v43 = vsel %vm327_vm5, %v1069_v34, %v2163_v33 }
 0x519   :  { %v708_v44 = vpop.permute.xlu0 %707 }
 0x51a   :  { %v714_v46 = vmul.f32 %v708_v44, %v2000_v17  ;;  %v715_v50 = vmul.f32 %v708_v44, %v2002_v18  ;;  %v716_v51 = vmul.f32 %v708_v44, %v2004_v19  ;;  %v717_v52 = vmul.f32 %v708_v44, %v2006_v20  ;;  %v1324_v19 = vld [vmem:[%s2468_s9] sm:$0xff]  ;;  %v1251_v20 = vld [vmem:[%s2469_s8 + $0x8] sm:$0xff] }
 0x51b   :  { %1500 = vmatprep.mubr.msk.f32.mxu0 %vm1330_vm9, %v1251_v20  ;;  %1501 = vmatprep.mubr.msk.f32.mxu1 %vm1330_vm9, %v1251_v20 }
 0x51c   :  { %v734_v53 = vadd.f32 %v728_v37, %v714_v46  ;;  %v736_v0 = vadd.f32 %v728_v37, %v716_v51  ;;  %v735_v55 = vadd.f32 %v728_v37, %v715_v50  ;;  %v737_v1 = vadd.f32 %v728_v37, %v717_v52  ;;  %v2264_v37 = vpop.permute.xlu1 %1076 }
 0x51e   :  { %v2174_v57 = vmax.f32 %v734_v53, 0.0  ;;  %v2176_v3 = vmax.f32 %v736_v0, 0.0  ;;  %v2182_v17 = vmax.f32 %v735_v55, 0.0  ;;  %v2184_v18 = vmax.f32 %v737_v1, 0.0 }
 0x51f   :  { %v841_v1 = vrot.slane %v1493_v36, %v1820_v49 }
 0x520   :  { %756 = vrot.lane.b32.xlu0 %v2176_v3, %s1625_s2  ;;  %748 = vrot.lane.b32.xlu1 %v2174_v57, %s1625_s2 }
 0x521   :  { %v855_v59 = vmul.f32 %v841_v1, %v2091_v38 }
 0x524   :  { %760 = vrot.lane.b32.xlu0 %v2184_v18, %s1625_s2  ;;  %752 = vrot.lane.b32.xlu1 %v2182_v17, %s1625_s2 }
 0x528   :  { %810 = vrot.lane.b32.xlu0 %v2174_v57, %s1626_s3  ;;  %1126 = vrot.lane.b32.xlu1 %v2016_v30, %s1631_s16 }
 0x52c   :  { %814 = vrot.lane.b32.xlu0 %v2182_v17, %s1626_s3  ;;  %1130 = vrot.lane.b32.xlu1 %v2020_v35, %s1631_s16 }
 0x530   :  { %818 = vrot.lane.b32.xlu0 %v2176_v3, %s1626_s3  ;;  %1134 = vrot.lane.b32.xlu1 %v2025_v40, %s1631_s16 }
 0x534   :  { %822 = vrot.lane.b32.xlu0 %v2184_v18, %s1626_s3  ;;  %1138 = vrot.lane.b32.xlu1 %v2029_v42, %s1631_s16 }
 0x538   :  { %872 = vrot.lane.b32.xlu0 %v2174_v57, %s1627_s12  ;;  %1188 = vrot.lane.b32.xlu1 %v2016_v30, %s1632_s17 }
 0x53c   :  { %876 = vrot.lane.b32.xlu0 %v2182_v17, %s1627_s12  ;;  %1192 = vrot.lane.b32.xlu1 %v2020_v35, %s1632_s17 }
 0x540   :  { %880 = vrot.lane.b32.xlu0 %v2176_v3, %s1627_s12  ;;  %1196 = vrot.lane.b32.xlu1 %v2025_v40, %s1632_s17 }
 0x544   :  { %884 = vrot.lane.b32.xlu0 %v2184_v18, %s1627_s12  ;;  %1200 = vrot.lane.b32.xlu1 %v2029_v42, %s1632_s17 }
 0x548   :  { %934 = vrot.lane.b32.xlu0 %v2174_v57, %s1628_s13  ;;  %1327 = vperm.xlu1 %1616, %v1324_v19  }
 0x54c   :  { %938 = vrot.lane.b32.xlu0 %v2182_v17, %s1628_s13 }
 0x550   :  { %942 = vrot.lane.b32.xlu0 %v2176_v3, %s1628_s13 }
 0x554   :  { %946 = vrot.lane.b32.xlu0 %v2184_v18, %s1628_s13 }
 0x558   :  { %1004 = vrot.lane.b32.xlu0 %v2174_v57, %s1629_s14 }
 0x55c   :  { %1008 = vrot.lane.b32.xlu0 %v2182_v17, %s1629_s14 }
 0x560   :  { %1012 = vrot.lane.b32.xlu0 %v2176_v3, %s1629_s14 }
 0x564   :  { %1016 = vrot.lane.b32.xlu0 %v2184_v18, %s1629_s14 }
 0x568   :  { %1066 = vrot.lane.b32.xlu0 %v2174_v57, %s1630_s15 }
 0x56c   :  { %1070 = vrot.lane.b32.xlu0 %v2182_v17, %s1630_s15 }
 0x570   :  { %1074 = vrot.lane.b32.xlu0 %v2176_v3, %s1630_s15 }
 0x574   :  { %1078 = vrot.lane.b32.xlu0 %v2184_v18, %s1630_s15 }
 0x578   :  { %1128 = vrot.lane.b32.xlu0 %v2174_v57, %s1631_s16 }
 0x57c   :  { %1132 = vrot.lane.b32.xlu0 %v2182_v17, %s1631_s16 }
 0x580   :  { %1136 = vrot.lane.b32.xlu0 %v2176_v3, %s1631_s16 }
 0x584   :  { %1140 = vrot.lane.b32.xlu0 %v2184_v18, %s1631_s16 }
 0x588   :  { %1190 = vrot.lane.b32.xlu0 %v2174_v57, %s1632_s17 }
 0x58c   :  { %1194 = vrot.lane.b32.xlu0 %v2182_v17, %s1632_s17 }
 0x590   :  { %1198 = vrot.lane.b32.xlu0 %v2176_v3, %s1632_s17 }
 0x592   :  { %v757_v11 = vpop.permute.xlu0 %756  ;;  %v749_v15 = vpop.permute.xlu1 %748 }
 0x594   :  { %1202 = vrot.lane.b32.xlu0 %v2184_v18, %s1632_s17 }
 0x596   :  { %v761_v58 = vpop.permute.xlu0 %760  ;;  %v753_v10 = vpop.permute.xlu1 %752 }
 0x597   :  { %v763_v28 = vsel %vm104_vm0, %v757_v11, %v761_v58  ;;  %v769_v34 = vsel %vm104_vm0, %v761_v58, %v749_v15  ;;  %v765_v44 = vsel %vm104_vm0, %v753_v10, %v757_v11  ;;  %v767_v45 = vsel %vm104_vm0, %v749_v15, %v753_v10 }
 0x598   :  { %v796_v46 = vmul.f32 %v775_v8, %v769_v34  ;;  %v799_v48 = vmul.f32 %v787_v9, %v763_v28  ;;  %v797_v50 = vmul.f32 %v779_v62, %v767_v45  ;;  %v798_v41 = vmul.f32 %v783_v5, %v765_v44  ;;  %v1494_v45 = vld [vmem:[%s2464_s1 + $0x2] ss:$8 sm:$0xf] }
 0x599   :  { %v837_v9 = vrot.slane %v1493_v36, %v1838_v60  ;;  %v849_v11 = vrot.slane %v1493_v36, %v1842_v7 }
 0x59a   :  { %v1536_v51 = vpack.c.bf16 %v796_v46, %v792_v22  ;;  %v1572_v52 = vpack.c.bf16 %v798_v41, %v794_v4  ;;  %v811_v53 = vpop.permute.xlu0 %810  ;;  %v1534_v0 = vpack.c.bf16 %v797_v50, %v793_v16  ;;  %v1570_v55 = vpack.c.bf16 %v799_v48, %v795_v25 }
 0x59b   :  { %v845_v16 = vrot.slane %v1493_v36, %v1840_v6  ;;  %v854_v58 = vmul.f32 %v837_v9, %v2103_v2  ;;  %v857_v10 = vmul.f32 %v849_v11, %v2099_v56  ;;  %v903_v36 = vrot.slane %v1494_v45, %v1820_v49 }
 0x59c   :  { %1535 = vmatprep.subr.bf16.mxu0 %v1534_v0  ;;  %1571 = vmatprep.subr.bf16.mxu1 %v1570_v55  ;;  %v899_v0 = vrot.slane %v1494_v45, %v1838_v60  ;;  %v911_v55 = vrot.slane %v1494_v45, %v1842_v7 }
 0x59d   :  { %1537 = vmatpush1.bf16.msra.mxu0 %v1536_v51  ;;  %1573 = vmatpush1.bf16.msra.mxu1 %v1572_v52  ;;  %v856_v44 = vmul.f32 %v845_v16, %v2095_v54  ;;  %v917_v51 = vmul.f32 %v903_v36, %v2107_v61 }
 0x59e   :  { %v815_v19 = vpop.permute.xlu0 %814 }
 0x59f   :  { %v829_v20 = vsel %vm147_vm1, %v811_v53, %v815_v19 }
 0x5a0   :  { %v859_v62 = vmul.f32 %v841_v1, %v829_v20 }
 0x5a2   :  { %v819_v5 = vpop.permute.xlu0 %818  ;;  %v1538_v8 = vpack.c.bf16 %v859_v62, %v855_v59 }
 0x5a3   :  { %v827_v15 = vsel %vm147_vm1, %v815_v19, %v819_v5  ;;  %v907_v19 = vrot.slane %v1494_v45, %v1840_v6 }
 0x5a4   :  { %1539 = vmatprep.subr.bf16.mxu0 %v1538_v8  ;;  %v860_v22 = vmul.f32 %v845_v16, %v827_v15  ;;  %v919_v8 = vmul.f32 %v911_v55, %v2118_v13  ;;  %v1495_v16 = vld [vmem:[%s2464_s1 + $0x3] ss:$8 sm:$0xf] }
 0x5a5   :  { %v918_v15 = vmul.f32 %v907_v19, %v2111_v63  ;;  %v973_v45 = vrot.slane %v1495_v16, %v1842_v7 }
 0x5a6   :  { %v823_v4 = vpop.permute.xlu0 %822  ;;  %v1576_v41 = vpack.c.bf16 %v860_v22, %v856_v44  ;;  %v961_v44 = vrot.slane %v1495_v16, %v1838_v60 }
 0x5a7   :  { %v825_v25 = vsel %vm147_vm1, %v819_v5, %v823_v4  ;;  %v831_v38 = vsel %vm147_vm1, %v823_v4, %v811_v53  ;;  %v916_v5 = vmul.f32 %v899_v0, %v2122_v14 }
 0x5a8   :  { %v858_v28 = vmul.f32 %v837_v9, %v831_v38  ;;  %v861_v34 = vmul.f32 %v849_v11, %v825_v25 }
 0x5aa   :  { %v1540_v46 = vpack.c.bf16 %v858_v28, %v854_v58  ;;  %v873_v48 = vpop.permute.xlu0 %872  ;;  %v1574_v50 = vpack.c.bf16 %v861_v34, %v857_v10  ;;  %v965_v58 = vrot.slane %v1495_v16, %v1820_v49 }
 0x5ac   :  { %1541 = vmatpush1.bf16.msra.mxu0 %v1540_v46  ;;  %1575 = vmatprep.subr.bf16.mxu1 %v1574_v50  ;;  %v979_v10 = vmul.f32 %v965_v58, %v2126_v12 }
 0x5ad   :  { %1577 = vmatpush1.bf16.msra.mxu1 %v1576_v41 }
 0x5ae   :  { %v877_v2 = vpop.permute.xlu0 %876 }
 0x5af   :  { %v891_v56 = vsel %vm191_vm2, %v873_v48, %v877_v2 }
 0x5b0   :  { %v921_v54 = vmul.f32 %v903_v36, %v891_v56  ;;  %v981_v56 = vmul.f32 %v973_v45, %v2134_v23  ;;  %v1496_v23 = vld [vmem:[%s2464_s1 + $0x5] ss:$8 sm:$0xf] }
 0x5b2   :  { %v881_v52 = vpop.permute.xlu0 %880  ;;  %v1542_v53 = vpack.c.bf16 %v921_v54, %v917_v51 }
 0x5b3   :  { %v889_v1 = vsel %vm191_vm2, %v877_v2, %v881_v52  ;;  %v978_v2 = vmul.f32 %v961_v44, %v2138_v24 }
 0x5b4   :  { %1543 = vmatprep.subr.bf16.mxu0 %v1542_v53  ;;  %v922_v59 = vmul.f32 %v907_v19, %v889_v1  ;;  %v1550_v19 = vpack.c.bf16 %v2182_v17, %v2020_v35  ;;  %v1035_v35 = vrot.slane %v1496_v23, %v1820_v49 }
 0x5b6   :  { %v885_v20 = vpop.permute.xlu0 %884  ;;  %v1580_v38 = vpack.c.bf16 %v922_v59, %v918_v15  ;;  %v1588_v59 = vpack.c.bf16 %v2176_v3, %v2025_v40  ;;  %v1043_v40 = vrot.slane %v1496_v23, %v1842_v7 }
 0x5b7   :  { %v887_v62 = vsel %vm191_vm2, %v881_v52, %v885_v20  ;;  %v893_v61 = vsel %vm191_vm2, %v885_v20, %v873_v48  ;;  %v969_v48 = vrot.slane %v1495_v16, %v1840_v6  ;;  %v1586_v20 = vpack.c.bf16 %v2184_v18, %v2029_v42 }
 0x5b8   :  { %v920_v9 = vmul.f32 %v899_v0, %v893_v61  ;;  %v923_v11 = vmul.f32 %v911_v55, %v887_v62  ;;  %v1031_v42 = vrot.slane %v1496_v23, %v1838_v60 }
 0x5b9   :  { %v980_v52 = vmul.f32 %v969_v48, %v2130_v21  ;;  %v1552_v21 = vpack.c.bf16 %v2174_v57, %v2016_v30  ;;  %v1039_v30 = vrot.slane %v1496_v23, %v1840_v6 }
 0x5ba   :  { %v1544_v4 = vpack.c.bf16 %v920_v9, %v916_v5  ;;  %v935_v22 = vpop.permute.xlu0 %934  ;;  %v1578_v25 = vpack.c.bf16 %v923_v11, %v919_v8  ;;  %v1049_v5 = vmul.f32 %v1035_v35, %v2146_v27  ;;  %v1048_v3 = vmul.f32 %v1031_v42, %v2142_v26 }
 0x5bb   :  { %v1051_v27 = vmul.f32 %v1043_v40, %v2154_v31 }
 0x5bc   :  { %1545 = vmatpush1.bf16.msra.mxu0 %v1544_v4  ;;  %1579 = vmatprep.subr.bf16.mxu1 %v1578_v25  ;;  %v1050_v4 = vmul.f32 %v1039_v30, %v2150_v29 }
 0x5bd   :  { %1581 = vmatpush1.bf16.msra.mxu1 %v1580_v38 }
 0x5be   :  { %v939_v14 = vpop.permute.xlu0 %938 }
 0x5bf   :  { %v953_v13 = vsel %vm235_vm3, %v935_v22, %v939_v14 }
 0x5c0   :  { %v983_v63 = vmul.f32 %v965_v58, %v953_v13  ;;  %v1497_v13 = vld [vmem:[%s2464_s1 + $0x6] ss:$8 sm:$0xf] }
 0x5c1   :  { %v1097_v29 = vrot.slane %v1497_v13, %v1820_v49 }
 0x5c2   :  { %v943_v28 = vpop.permute.xlu0 %942  ;;  %v1546_v34 = vpack.c.bf16 %v983_v63, %v979_v10 }
 0x5c3   :  { %v951_v46 = vsel %vm235_vm3, %v939_v14, %v943_v28 }
 0x5c4   :  { %1547 = vmatprep.subr.bf16.mxu0 %v1546_v34  ;;  %v984_v41 = vmul.f32 %v969_v48, %v951_v46  ;;  %v1111_v46 = vmul.f32 %v1097_v29, %v2168_v43  ;;  %v1101_v48 = vrot.slane %v1497_v13, %v1840_v6 }
 0x5c6   :  { %v947_v50 = vpop.permute.xlu0 %946  ;;  %v1584_v1 = vpack.c.bf16 %v984_v41, %v980_v52 }
 0x5c7   :  { %v949_v36 = vsel %vm235_vm3, %v943_v28, %v947_v50  ;;  %v955_v12 = vsel %vm235_vm3, %v947_v50, %v935_v22  ;;  %v1127_v22 = vpop.permute.xlu1 %1126  ;;  %v1093_v28 = vrot.slane %v1497_v13, %v1838_v60  ;;  %v1105_v50 = vrot.slane %v1497_v13, %v1842_v7 }
 0x5c8   :  { %v982_v51 = vmul.f32 %v961_v44, %v955_v12  ;;  %v985_v54 = vmul.f32 %v973_v45, %v949_v36 }
 0x5c9   :  { %v1110_v12 = vmul.f32 %v1093_v28, %v2161_v39 }
 0x5ca   :  { %v1548_v53 = vpack.c.bf16 %v982_v51, %v978_v2  ;;  %v1005_v0 = vpop.permute.xlu0 %1004  ;;  %v1582_v55 = vpack.c.bf16 %v985_v54, %v981_v56  ;;  %v1080_v2 = vsel %vm327_vm5, %v2163_v33, %v2264_v37  ;;  %v1086_v56 = vsel %vm327_vm5, %v2264_v37, %v2156_v32  ;;  %v1498_v32 = vld [vmem:[%s2464_s1 + $0x7] ss:$8 sm:$0xf] }
 0x5cb   :  { %v1131_v10 = vpop.permute.xlu1 %1130  ;;  %v1112_v39 = vmul.f32 %v1101_v48, %v1080_v2 }
 0x5cc   :  { %1549 = vmatpush1.bf16.msra.mxu0 %v1548_v53  ;;  %1583 = vmatprep.subr.bf16.mxu1 %v1582_v55 }
 0x5cd   :  { %1551 = vmatprep.subr.bf16.mxu0 %v1550_v19  ;;  %1585 = vmatpush1.bf16.msra.mxu1 %v1584_v1 }
 0x5ce   :  { %v1009_v24 = vpop.permute.xlu0 %1008  ;;  %1587 = vmatprep.subr.bf16.mxu1 %v1586_v20 }
 0x5cf   :  { %v1023_v17 = vsel %vm283_vm4, %v1005_v0, %v1009_v24  ;;  %v1135_v41 = vpop.permute.xlu1 %1134 }
 0x5d0   :  { %1553 = vmatpush1.bf16.msra.mxu0 %v1552_v21  ;;  %v1052_v62 = vmul.f32 %v1031_v42, %v1023_v17  ;;  %v1144_v17 = vsel %vm371_vm6, %v1131_v10, %v1135_v41  ;;  %v1146_v42 = vsel %vm371_vm6, %v1127_v22, %v1131_v10 }
 0x5d1   :  { %1589 = vmatpush1.bf16.msra.mxu1 %v1588_v59 }
 0x5d2   :  { %v1013_v18 = vpop.permute.xlu0 %1012  ;;  %v1556_v11 = vpack.c.bf16 %v1052_v62, %v1048_v3 }
 0x5d3   :  { %v1021_v61 = vsel %vm283_vm4, %v1009_v24, %v1013_v18  ;;  %v1139_v33 = vpop.permute.xlu1 %1138  ;;  %v1159_v24 = vrot.slane %v1498_v32, %v1820_v49 }
 0x5d4   :  { %v1053_v57 = vmul.f32 %v1035_v35, %v1021_v61  ;;  %v1155_v35 = vrot.slane %v1498_v32, %v1838_v60 }
 0x5d6   :  { %v1017_v8 = vpop.permute.xlu0 %1016  ;;  %v1554_v9 = vpack.c.bf16 %v1053_v57, %v1049_v5  ;;  %v1173_v5 = vmul.f32 %v1159_v24, %v1144_v17  ;;  %v1172_v3 = vmul.f32 %v1155_v35, %v1146_v42 }
 0x5d7   :  { %v1019_v15 = vsel %vm283_vm4, %v1013_v18, %v1017_v8  ;;  %v1025_v16 = vsel %vm283_vm4, %v1017_v8, %v1005_v0  ;;  %v1113_v0 = vmul.f32 %v1105_v50, %v1086_v56  ;;  %v1189_v21 = vpop.permute.xlu1 %1188  ;;  %v1142_v8 = vsel %vm371_vm6, %v1135_v41, %v1139_v33 }
 0x5d8   :  { %v1054_v25 = vmul.f32 %v1039_v30, %v1019_v15  ;;  %v1055_v38 = vmul.f32 %v1043_v40, %v1025_v16  ;;  %1555 = vmatprep.subr.bf16.mxu0 %v1554_v9  ;;  %v1163_v30 = vrot.slane %v1498_v32, %v1840_v6  ;;  %v1167_v40 = vrot.slane %v1498_v32, %v1842_v7 }
 0x5d9   :  { %1557 = vmatpush1.bf16.msra.mxu0 %v1556_v11  ;;  %v1148_v9 = vsel %vm371_vm6, %v1139_v33, %v1127_v22  ;;  %v1250_v33 = vld [vmem:[%s2469_s8] sm:$0xff] }
 0x5da   :  { %v1592_v58 = vpack.c.bf16 %v1054_v25, %v1050_v4  ;;  %v1067_v26 = vpop.permute.xlu0 %1066  ;;  %v1590_v14 = vpack.c.bf16 %v1055_v38, %v1051_v27  ;;  %v1174_v38 = vmul.f32 %v1163_v30, %v1142_v8 }
 0x5db   :  { %v1193_v11 = vpop.permute.xlu1 %1192 }
 0x5dc   :  { %1591 = vmatprep.subr.bf16.mxu1 %v1590_v14 }
 0x5dd   :  { %1593 = vmatpush1.bf16.msra.mxu1 %v1592_v58  ;;  %v1175_v58 = vmul.f32 %v1167_v40, %v1148_v9 }
 0x5de   :  { %v1071_v63 = vpop.permute.xlu0 %1070 }
 0x5df   :  { %v1085_v31 = vsel %vm327_vm5, %v1067_v26, %v1071_v63  ;;  %v1197_v22 = vpop.permute.xlu1 %1196 }
 0x5e0   :  { %v1114_v44 = vmul.f32 %v1093_v28, %v1085_v31 }
 0x5e2   :  { %v1075_v34 = vpop.permute.xlu0 %1074  ;;  %v1560_v54 = vpack.c.bf16 %v1114_v44, %v1110_v12 }
 0x5e3   :  { %v1083_v45 = vsel %vm327_vm5, %v1071_v63, %v1075_v34 }
 0x5e4   :  { %v1115_v36 = vmul.f32 %v1097_v29, %v1083_v45  ;;  %v1499_v29 = vld [vmem:[%s2464_s1 + $0x20] ss:$8 sm:$0xf]  ;;  %v1206_v45 = vsel %vm415_vm7, %v1193_v11, %v1197_v22 }
 0x5e5   :  { %v1221_v28 = vrot.slane %v1499_v29, %v1820_v49  ;;  %v1217_v44 = vrot.slane %v1499_v29, %v1838_v60  ;;  %v1225_v49 = vrot.slane %v1499_v29, %v1840_v6  ;;  %v1229_v2 = vrot.slane %v1499_v29, %v1842_v7 }
 0x5e6   :  { %v1079_v51 = vpop.permute.xlu0 %1078  ;;  %v1558_v43 = vpack.c.bf16 %v1115_v36, %v1111_v46  ;;  %v1208_v46 = vsel %vm415_vm7, %v1189_v21, %v1193_v11 }
 0x5e7   :  { %v1081_v52 = vsel %vm327_vm5, %v1075_v34, %v1079_v51  ;;  %v1087_v53 = vsel %vm327_vm5, %v1079_v51, %v1067_v26  ;;  %v1235_v12 = vmul.f32 %v1221_v28, %v1206_v45  ;;  %v1234_v51 = vmul.f32 %v1217_v44, %v1208_v46 }
 0x5e8   :  { %v1116_v55 = vmul.f32 %v1101_v48, %v1081_v52  ;;  %v1117_v1 = vmul.f32 %v1105_v50, %v1087_v53  ;;  %1559 = vmatprep.subr.bf16.mxu0 %v1558_v43  ;;  %v1201_v48 = vpop.permute.xlu1 %1200 }
 0x5e9   :  { %1561 = vmatpush1.bf16.msra.mxu0 %v1560_v54  ;;  %v1204_v60 = vsel %vm415_vm7, %v1197_v22, %v1201_v48  ;;  %v1210_v43 = vsel %vm415_vm7, %v1201_v48, %v1189_v21 }
 0x5ea   :  { %v1596_v19 = vpack.c.bf16 %v1116_v55, %v1112_v39  ;;  %v1129_v20 = vpop.permute.xlu0 %1128  ;;  %v1594_v23 = vpack.c.bf16 %v1117_v1, %v1113_v0  ;;  %v1236_v6 = vmul.f32 %v1225_v49, %v1204_v60  ;;  %v1237_v55 = vmul.f32 %v1229_v2, %v1210_v43 }
 0x5ec   :  { %1595 = vmatprep.subr.bf16.mxu1 %v1594_v23  ;;  %v1328_v23 = vpop.permute.xlu1 %1327 }
 0x5ed   :  { %1597 = vmatpush1.bf16.msra.mxu1 %v1596_v19 }
 0x5ee   :  { %v1133_v37 = vpop.permute.xlu0 %1132 }
 0x5ef   :  { %v1147_v59 = vsel %vm371_vm6, %v1129_v20, %v1133_v37 }
 0x5f0   :  { %v1176_v62 = vmul.f32 %v1155_v35, %v1147_v59 }
 0x5f2   :  { %v1137_v18 = vpop.permute.xlu0 %1136  ;;  %v1564_v4 = vpack.c.bf16 %v1176_v62, %v1172_v3 }
 0x5f3   :  { %v1145_v61 = vsel %vm371_vm6, %v1133_v37, %v1137_v18 }
 0x5f4   :  { %v1177_v57 = vmul.f32 %v1159_v24, %v1145_v61 }
 0x5f6   :  { %v1141_v15 = vpop.permute.xlu0 %1140  ;;  %v1562_v16 = vpack.c.bf16 %v1177_v57, %v1173_v5 }
 0x5f7   :  { %v1143_v27 = vsel %vm371_vm6, %v1137_v18, %v1141_v15  ;;  %v1149_v25 = vsel %vm371_vm6, %v1141_v15, %v1129_v20 }
 0x5f8   :  { %v1178_v26 = vmul.f32 %v1163_v30, %v1143_v27  ;;  %v1179_v14 = vmul.f32 %v1167_v40, %v1149_v25  ;;  %1563 = vmatprep.subr.bf16.mxu0 %v1562_v16 }
 0x5f9   :  { %1565 = vmatpush1.bf16.msra.mxu0 %v1564_v4 }
 0x5fa   :  { %v1600_v13 = vpack.c.bf16 %v1178_v26, %v1174_v38  ;;  %v1191_v10 = vpop.permute.xlu0 %1190  ;;  %v1598_v63 = vpack.c.bf16 %v1179_v14, %v1175_v58 }
 0x5fc   :  { %1599 = vmatprep.subr.bf16.mxu1 %v1598_v63 }
 0x5fd   :  { %1601 = vmatpush1.bf16.msra.mxu1 %v1600_v13 }
 0x5fe   :  { %v1195_v31 = vpop.permute.xlu0 %1194 }
 0x5ff   :  { %v1209_v34 = vsel %vm415_vm7, %v1191_v10, %v1195_v31 }
 0x600   :  { %v1238_v41 = vmul.f32 %v1217_v44, %v1209_v34 }
 0x602   :  { %v1199_v50 = vpop.permute.xlu0 %1198  ;;  %v1568_v53 = vpack.c.bf16 %v1238_v41, %v1234_v51 }
 0x603   :  { %v1207_v36 = vsel %vm415_vm7, %v1195_v31, %v1199_v50 }
 0x604   :  { %v1239_v56 = vmul.f32 %v1221_v28, %v1207_v36 }
 0x606   :  { %v1203_v54 = vpop.permute.xlu0 %1202  ;;  %v1566_v52 = vpack.c.bf16 %v1239_v56, %v1235_v12 }
 0x607   :  { %v1205_v39 = vsel %vm415_vm7, %v1199_v50, %v1203_v54  ;;  %v1211_v0 = vsel %vm415_vm7, %v1203_v54, %v1191_v10 }
 0x608   :  { %v1240_v7 = vmul.f32 %v1225_v49, %v1205_v39  ;;  %v1241_v1 = vmul.f32 %v1229_v2, %v1211_v0  ;;  %1567 = vmatprep.subr.bf16.mxu0 %v1566_v52 }
 0x609   :  { %1569 = vmatpush1.bf16.msra.mxu0 %v1568_v53 }
 0x60a   :  { %v1604_v19 = vpack.c.bf16 %v1240_v7, %v1236_v6  ;;  %v1602_v20 = vpack.c.bf16 %v1241_v1, %v1237_v55 }
 0x60c   :  { %1399 = vmatmul.mubr.f32.vlgmr.msra.gmra.mrb[2].mxu0 %v1250_v33  ;;  %1603 = vmatprep.subr.bf16.mxu1 %v1602_v20 }
 0x60d   :  { %1605 = vmatpush1.bf16.msra.mxu1 %v1604_v19 }
 0x610   :  { %1470 = vmatmul.mubr.f32.vlgmr.msra.gmra.mrb[2].mxu1 %v1250_v33 }
 0x6df   :  { %v1400_v32 = vpop.f32.mrb[2].mxu0 }
 0x6e0   :  { %v1401_v47 = vadd.f32 %v1400_v32, %v1328_v23  ;;  %v1402_v37 = vpop.f32.mrb[3].mxu0 }
 0x6e1   :  { %v1403_v24 = vadd.f32 %v1402_v37, %v1328_v23 }
 0x6e2   :  { %1476 = vst [vmem:[%s2460_s10 + $0x40] sm:$0xff] %v1401_v47 }
 0x6e3   :  { %1477 = vst [vmem:[%s2460_s10 + $0x48] sm:$0xff] %v1403_v24  ;;  %v1471_v21 = vpop.f32.mrb[2].mxu1 }
 0x6e4   :  { %v1472_v59 = vadd.f32 %v1471_v21, %v1328_v23  ;;  %v1473_v35 = vpop.f32.mrb[3].mxu1 }
 0x6e5   :  { %v1474_v17 = vadd.f32 %v1473_v35, %v1328_v23 }
 0x6e6   :  { %1478 = vst [vmem:[%s2460_s10 + $0x50] sm:$0xff] %v1472_v59 }
 0x6e7   :  { %1479 = vst [vmem:[%s2460_s10 + $0x58] sm:$0xff] %v1474_v17 }

</bundles_post_ra>
